<compile_context>
chip_gen: v5e
topology: v5e:2x2
jax: 0.10.0
libtpu: 0.0.40
codegen_flags: <defaults>
</compile_context>

<pallas_src>
import math

import numpy as np
import jax
import jax.numpy as jnp
from jax.experimental import pallas as pl
from jax.experimental.pallas import tpu as pltpu


# ----------------------------------------------------------------------------
# Fused kernel: one grid step == one batch tile (B_TILE samples stacked along
# the sublane/row axis in NHWC-flattened (row, W*C) layout).
# ----------------------------------------------------------------------------
def _fmdqn_kernel(x_ref, a1_ref, b1_ref, sw1_ref, sh1_ref,
                  a2_ref, b2_ref, sw2_ref, g_ref,
                  wf1_ref, bf1_ref, wf2_ref, bf2_ref, wf3_ref, bf3_ref,
                  o_ref):
    f32 = jnp.float32
    bf16 = jnp.bfloat16

    def banded_conv_relu(x2, a_ref, b_ref):
        """x2 (R, W*Cin) bf16 -> ReLU(conv)+bias, shape (R-kh+1, OW*Cout) f32.

        Convolution as a sum over kernel rows of "banded" matmuls; weights were
        pre-expanded at init so no in-kernel im2col / reshapes are needed."""
        kh = a_ref.shape[0]
        m = x2.shape[0] - kh + 1
        y = jnp.dot(x2[0:m], a_ref[0], preferred_element_type=f32)
        for di in range(1, kh):
            y = y + jnp.dot(x2[di:di + m], a_ref[di],
                            preferred_element_type=f32)
        return jnp.maximum(y + b_ref[...], 0.0)

    def wpool(y, sw_ref):
        """2-wide max over the W direction via exact 0/1 selection matmuls."""
        yc = y.astype(bf16)
        return jnp.maximum(
            jnp.dot(yc, sw_ref[0], preferred_element_type=f32),
            jnp.dot(yc, sw_ref[1], preferred_element_type=f32))

    def hpool(y, sh_ref):
        """2-tall max over the (sample-stacked) H direction via 0/1 row
        selectors (these also re-stride samples from H to H//2 rows)."""
        yc = y.astype(bf16)
        return jnp.maximum(
            jnp.dot(sh_ref[0], yc, preferred_element_type=f32),
            jnp.dot(sh_ref[1], yc, preferred_element_type=f32))

    x = x_ref[...]                                        # (B*H, W*Cin) bf16
    y1 = banded_conv_relu(x, a1_ref, b1_ref)              # conv1 + ReLU
    p1 = hpool(wpool(y1, sw1_ref), sh1_ref)               # pool1 (B*Hp1, PW1*C1)
    y2 = banded_conv_relu(p1.astype(bf16), a2_ref, b2_ref)  # conv2 + ReLU
    w2 = wpool(y2, sw2_ref).astype(bf16)                  # W-pooled conv2 (M2, PW2*C2)

    # pool2 H-direction + per-sample row gather, fused straight into fc1:
    #   g_ref[2*ph+phase] : (B_TILE, M2) 0/1, selects row (b*Hp1 + 2*ph + phase)
    #   wf1_ref[ph]       : (PW2*C2, hidden1) fc1 weights for pooled row ph,
    #                       reordered for PyTorch's NCHW flatten.
    nph = wf1_ref.shape[0]
    h = None
    for ph in range(nph):
        gph = jnp.maximum(
            jnp.dot(g_ref[2 * ph], w2, preferred_element_type=f32),
            jnp.dot(g_ref[2 * ph + 1], w2, preferred_element_type=f32))
        t = jnp.dot(gph.astype(bf16), wf1_ref[ph], preferred_element_type=f32)
        h = t if h is None else h + t
    h = jnp.maximum(h + bf1_ref[...], 0.0)                # (B_TILE, hidden1)
    h = jnp.maximum(jnp.dot(h.astype(bf16), wf2_ref[...],
                            preferred_element_type=f32) + bf2_ref[...], 0.0)
    o_ref[...] = (jnp.dot(h.astype(bf16), wf3_ref[...],
                          preferred_element_type=f32) + bf3_ref[...])


# ----------------------------------------------------------------------------
# One-time (init) weight preprocessing — everything non-matmul is hoisted here.
# ----------------------------------------------------------------------------
def prepare_params(p, input_dim, b_tile=8):
    C, H, W = input_dim
    w1 = np.asarray(p["w1"], np.float32)
    cout1, _, kh, kw = w1.shape
    oh1, ow1 = H - kh + 1, W - kw + 1
    ph1, pw1 = oh1 // 2, ow1 // 2
    cout2 = np.asarray(p["w2"]).shape[0]
    oh2, ow2 = ph1 - kh + 1, pw1 - kw + 1
    ph2, pw2 = oh2 // 2, ow2 // 2
    hp1 = H // 2                        # per-sample row stride after pool1
    m1 = b_tile * H - (kh - 1)          # conv1 output rows (stacked tile)
    m2 = b_tile * hp1 - (kh - 1)        # conv2 output rows (stacked tile)
    hidden1 = np.asarray(p["fw1"]).shape[0]
    hidden2 = np.asarray(p["fw2"]).shape[0]
    out_size = np.asarray(p["fw3"]).shape[0]
    out_pad = ((out_size + 127) // 128) * 128   # lane-dense fc3/output width

    def banded(w, in_w):
        wn = np.asarray(w, np.float32)
        co, ci, kh_, kw_ = wn.shape
        ow = in_w - kw_ + 1
        a = np.zeros((kh_, in_w * ci, ow * co), np.float32)
        for di in range(kh_):
            for o in range(ow):
                for dj in range(kw_):
                    col = o + dj
                    a[di, col * ci:(col + 1) * ci, o * co:(o + 1) * co] = \
                        wn[:, :, di, dj].T
        return a

    def wpool_sel(ow, c):
        pw = ow // 2
        s = np.zeros((2, ow * c, pw * c), np.float32)
        for phase in range(2):
            for pc in range(pw):
                for ch in range(c):
                    s[phase, (2 * pc + phase) * c + ch, pc * c + ch] = 1.0
        return s

    # H-pool1 row selectors on the sample-stacked layout (sample stride H
    # before pooling, hp1 after); unused rows stay all-zero (harmless).
    sh1 = np.zeros((2, b_tile * hp1, m1), np.float32)
    for phase in range(2):
        for b in range(b_tile):
            for i in range(ph1):
                sh1[phase, b * hp1 + i, b * H + 2 * i + phase] = 1.0

    # pool2-H + per-sample row gather selectors (feed fc1 directly).
    g = np.zeros((2 * ph2, b_tile, m2), np.float32)
    for ph in range(ph2):
        for phase in range(2):
            for b in range(b_tile):
                g[2 * ph + phase, b, b * hp1 + 2 * ph + phase] = 1.0

    # fc1 weights split by pooled row, reordered to absorb NCHW flatten order.
    fw1 = np.asarray(p["fw1"], np.float32)
    wf1 = np.zeros((ph2, pw2 * cout2, hidden1), np.float32)
    for ph in range(ph2):
        for pw in range(pw2):
            for c in range(cout2):
                wf1[ph, pw * cout2 + c, :] = \
                    fw1[:, c * (ph2 * pw2) + ph * pw2 + pw]

    # fc3 padded to a full 128-lane output slab (unmasked stores).
    wf3 = np.zeros((hidden2, out_pad), np.float32)
    wf3[:, :out_size] = np.asarray(p["fw3"], np.float32).T
    bf3 = np.zeros((1, out_pad), np.float32)
    bf3[0, :out_size] = np.asarray(p["fb3"], np.float32)

    bf16, f32 = jnp.bfloat16, jnp.float32

    def tile_bias(b, ow):   # conv bias broadcast over output columns
        return jnp.asarray(np.tile(np.asarray(b, np.float32), ow)[None, :], f32)

    return dict(
        a1=jnp.asarray(banded(p["w1"], W), bf16),
        b1=tile_bias(p["b1"], ow1),
        sw1=jnp.asarray(wpool_sel(ow1, cout1), bf16),
        sh1=jnp.asarray(sh1, bf16),
        a2=jnp.asarray(banded(p["w2"], pw1), bf16),
        b2=tile_bias(p["b2"], ow2),
        sw2=jnp.asarray(wpool_sel(ow2, cout2), bf16),
        g=jnp.asarray(g, bf16),
        wf1=jnp.asarray(wf1, bf16),
        bf1=jnp.asarray(np.asarray(p["fb1"], np.float32)[None, :], f32),
        wf2=jnp.asarray(np.asarray(p["fw2"], np.float32).T, bf16),
        bf2=jnp.asarray(np.asarray(p["fb2"], np.float32)[None, :], f32),
        wf3=jnp.asarray(wf3, bf16),
        bf3=jnp.asarray(bf3, f32),
    )


# ----------------------------------------------------------------------------
# Forward wrapper: a single pallas_call, grid over batch tiles ("parallel").
# ----------------------------------------------------------------------------
_WEIGHT_NAMES = ("a1", "b1", "sw1", "sh1", "a2", "b2", "sw2", "g",
                 "wf1", "bf1", "wf2", "bf2", "wf3", "bf3")


def _const_spec(a):
    zeros = (0,) * a.ndim

    def idx(n):
        return zeros

    return pl.BlockSpec(a.shape, idx)


def fmdqn_forward(x, kp, *, b_tile=8, out_size=3):
    """x: (N, C, H, W) float32 -> (N, out_size) float32."""
    N, C, H, W = x.shape
    wc = W * C
    grid = (N + b_tile - 1) // b_tile
    npad = grid * b_tile
    assert kp["sh1"].shape[1] == b_tile * (H // 2), \
        "prepare_params() was built for a different b_tile"

    # Hot-path glue: NCHW -> per-sample (H, W*C) NHWC-flat rows, samples
    # stacked along rows, padded to whole tiles, cast to bf16 for the MXU.
    # TODO(synk): store activations NHWC upstream (or use CompilerParams
    # allow_input_fusion) to avoid this extra HBM round-trip of the input.
    x3 = jnp.transpose(x, (0, 2, 3, 1)).reshape(N, H, wc)
    if npad != N:
        x3 = jnp.pad(x3, ((0, npad - N), (0, 0), (0, 0)))
    x3 = x3.reshape(npad * H, wc).astype(jnp.bfloat16)

    weights = [kp[k] for k in _WEIGHT_NAMES]
    out_pad = kp["bf3"].shape[1]

    in_specs = [pl.BlockSpec((b_tile * H, wc), lambda n: (n, 0))]
    in_specs += [_const_spec(w) for w in weights]

    out = pl.pallas_call(
        _fmdqn_kernel,
        out_shape=jax.ShapeDtypeStruct((npad, out_pad), jnp.float32),
        grid=(grid,),
        in_specs=in_specs,
        out_specs=pl.BlockSpec((b_tile, out_pad), lambda n: (n, 0)),
        compiler_params=pltpu.CompilerParams(
            dimension_semantics=("parallel",)),
    )(x3, *weights)
    return out[:N, :out_size]


# ----------------------------------------------------------------------------
# Parameters (PyTorch-style init) and pure-JAX reference
# ----------------------------------------------------------------------------
def init_params(key, input_dim=(4, 16, 16), f1=6, f2=16, fw=3,
                hidden1=128, hidden2=32, out_size=3):
    C, H, W = input_dim
    c1h, c1w = H - fw + 1, W - fw + 1
    c2h, c2w = c1h // 2 - fw + 1, c1w // 2 - fw + 1
    pool2_out = f2 * (c2h // 2) * (c2w // 2)

    def uni(k, shape, fan_in):
        bound = 1.0 / math.sqrt(fan_in)
        return jax.random.uniform(k, shape, jnp.float32, -bound, bound)

    ks = jax.random.split(key, 10)
    return {
        "w1": uni(ks[0], (f1, C, fw, fw), C * fw * fw),
        "b1": uni(ks[1], (f1,), C * fw * fw),
        "w2": uni(ks[2], (f2, f1, fw, fw), f1 * fw * fw),
        "b2": uni(ks[3], (f2,), f1 * fw * fw),
        "fw1": uni(ks[4], (hidden1, pool2_out), pool2_out),
        "fb1": uni(ks[5], (hidden1,), pool2_out),
        "fw2": uni(ks[6], (hidden2, hidden1), hidden1),
        "fb2": uni(ks[7], (hidden2,), hidden1),
        "fw3": uni(ks[8], (out_size, hidden2), hidden2),
        "fb3": uni(ks[9], (out_size,), hidden2),
    }


def reference_forward(x, p):
    """Pure-JAX (no Pallas) reference of FMDQNNet.forward for checking."""
    def conv(x, w, b):
        y = jax.lax.conv_general_dilated(
            x, w, (1, 1), "VALID", dimension_numbers=("NCHW", "OIHW", "NCHW"))
        return jax.nn.relu(y + b[None, :, None, None])

    def pool(x):
        return jax.lax.reduce_window(
            x, -jnp.inf, jax.lax.max, (1, 1, 2, 2), (1, 1, 2, 2), "VALID")

    x = pool(conv(x, p["w1"], p["b1"]))
    x = pool(conv(x, p["w2"], p["b2"]))
    x = x.reshape(x.shape[0], -1)
    x = jax.nn.relu(x @ p["fw1"].T + p["fb1"])
    x = jax.nn.relu(x @ p["fw2"].T + p["fb2"])
    return x @ p["fw3"].T + p["fb3"]


if __name__ == "__main__":
    key = jax.random.PRNGKey(0)
    kx, kparam = jax.random.split(key)

    # Small shapes consistent with the module: batch=2, channels=4, 16x16.
    input_dim = (4, 16, 16)
    b_tile = 8
    x = jax.random.normal(kx, (2,) + input_dim, jnp.float32)
    params = init_params(kparam, input_dim=input_dim)
    kparams = prepare_params(params, input_dim, b_tile=b_tile)  # one-time prep

    fwd = jax.jit(fmdqn_forward, static_argnames=("b_tile", "out_size"))
    out = jax.block_until_ready(fwd(x, kparams, b_tile=b_tile, out_size=3))
    assert out.shape == (2, 3), out.shape

    ref = jax.block_until_ready(reference_forward(x, params))
    # bf16 matmul operands (f32 accumulation) -> loosened tolerance.
    assert jnp.allclose(out, ref, rtol=2e-2, atol=2e-2), (out, ref)

    print("KERNEL_OK")
</pallas_src>

<mosaic_0001>
module attributes {stable_mosaic.version = 11 : i64} {
  func.func @_fmdqn_kernel(%arg0: i32, %arg1: memref<128x64xbf16, #tpu.memory_space<vmem>>, %arg2: memref<3x64x84xbf16, #tpu.memory_space<vmem>>, %arg3: memref<1x84xf32, #tpu.memory_space<vmem>>, %arg4: memref<2x84x42xbf16, #tpu.memory_space<vmem>>, %arg5: memref<2x64x126xbf16, #tpu.memory_space<vmem>>, %arg6: memref<3x42x80xbf16, #tpu.memory_space<vmem>>, %arg7: memref<1x80xf32, #tpu.memory_space<vmem>>, %arg8: memref<2x80x32xbf16, #tpu.memory_space<vmem>>, %arg9: memref<4x8x62xbf16, #tpu.memory_space<vmem>>, %arg10: memref<2x32x128xbf16, #tpu.memory_space<vmem>>, %arg11: memref<1x128xf32, #tpu.memory_space<vmem>>, %arg12: memref<128x32xbf16, #tpu.memory_space<vmem>>, %arg13: memref<1x32xf32, #tpu.memory_space<vmem>>, %arg14: memref<32x128xbf16, #tpu.memory_space<vmem>>, %arg15: memref<1x128xf32, #tpu.memory_space<vmem>>, %arg16: memref<8x128xf32, #tpu.memory_space<vmem>>) attributes {dimension_semantics = [#tpu.dimension_semantics<parallel>], iteration_bounds = array<i64: 1>, scalar_prefetch = 0 : i64, scratch_operands = 0 : i64, tpu.core_type = #tpu.core_type<tc>, window_params = [{transform_indices = @transform_0, window_bounds = array<i64: 128, 64>}, {pipeline_mode = #tpu.pipeline_mode<synchronous>, transform_indices = @transform_1, window_bounds = array<i64: 3, 64, 84>}, {pipeline_mode = #tpu.pipeline_mode<synchronous>, transform_indices = @transform_2, window_bounds = array<i64: 1, 84>}, {pipeline_mode = #tpu.pipeline_mode<synchronous>, transform_indices = @transform_3, window_bounds = array<i64: 2, 84, 42>}, {pipeline_mode = #tpu.pipeline_mode<synchronous>, transform_indices = @transform_4, window_bounds = array<i64: 2, 64, 126>}, {pipeline_mode = #tpu.pipeline_mode<synchronous>, transform_indices = @transform_5, window_bounds = array<i64: 3, 42, 80>}, {pipeline_mode = #tpu.pipeline_mode<synchronous>, transform_indices = @transform_6, window_bounds = array<i64: 1, 80>}, {pipeline_mode = #tpu.pipeline_mode<synchronous>, transform_indices = @transform_7, window_bounds = array<i64: 2, 80, 32>}, {pipeline_mode = #tpu.pipeline_mode<synchronous>, transform_indices = @transform_8, window_bounds = array<i64: 4, 8, 62>}, {pipeline_mode = #tpu.pipeline_mode<synchronous>, transform_indices = @transform_9, window_bounds = array<i64: 2, 32, 128>}, {pipeline_mode = #tpu.pipeline_mode<synchronous>, transform_indices = @transform_10, window_bounds = array<i64: 1, 128>}, {pipeline_mode = #tpu.pipeline_mode<synchronous>, transform_indices = @transform_11, window_bounds = array<i64: 128, 32>}, {pipeline_mode = #tpu.pipeline_mode<synchronous>, transform_indices = @transform_12, window_bounds = array<i64: 1, 32>}, {pipeline_mode = #tpu.pipeline_mode<synchronous>, transform_indices = @transform_13, window_bounds = array<i64: 32, 128>}, {pipeline_mode = #tpu.pipeline_mode<synchronous>, transform_indices = @transform_14, window_bounds = array<i64: 1, 128>}, {transform_indices = @transform_15, window_bounds = array<i64: 8, 128>}]} {
    %c0 = arith.constant 0 : index
    %c0_0 = arith.constant 0 : index
    %0 = vector.load %arg1[%c0, %c0_0] : memref<128x64xbf16, #tpu.memory_space<vmem>>, vector<128x64xbf16>
    %1 = vector.extract_strided_slice %0 {offsets = [0, 0], sizes = [126, 64], strides = [1, 1]} : vector<128x64xbf16> to vector<126x64xbf16>
    %c0_1 = arith.constant 0 : index
    %c0_2 = arith.constant 0 : index
    %c0_3 = arith.constant 0 : index
    %2 = vector.load %arg2[%c0_1, %c0_2, %c0_3] : memref<3x64x84xbf16, #tpu.memory_space<vmem>>, vector<1x64x84xbf16>
    %3 = vector.shape_cast %2 : vector<1x64x84xbf16> to vector<64x84xbf16>
    %cst = arith.constant dense<0.000000e+00> : vector<126x84xf32>
    %4 = tpu.matmul %1, %3, %cst {dimension_numbers = #tpu.dot_dimension_numbers<[1], [0], [0], [1], [0, 0, 1, 1], [], []>} : vector<126x64xbf16>, vector<64x84xbf16>, vector<126x84xf32> -> vector<126x84xf32>
    %5 = vector.extract_strided_slice %0 {offsets = [1, 0], sizes = [126, 64], strides = [1, 1]} : vector<128x64xbf16> to vector<126x64xbf16>
    %c1 = arith.constant 1 : index
    %c0_4 = arith.constant 0 : index
    %c0_5 = arith.constant 0 : index
    %6 = vector.load %arg2[%c1, %c0_4, %c0_5] : memref<3x64x84xbf16, #tpu.memory_space<vmem>>, vector<1x64x84xbf16>
    %7 = vector.shape_cast %6 : vector<1x64x84xbf16> to vector<64x84xbf16>
    %cst_6 = arith.constant dense<0.000000e+00> : vector<126x84xf32>
    %8 = tpu.matmul %5, %7, %cst_6 {dimension_numbers = #tpu.dot_dimension_numbers<[1], [0], [0], [1], [0, 0, 1, 1], [], []>} : vector<126x64xbf16>, vector<64x84xbf16>, vector<126x84xf32> -> vector<126x84xf32>
    %9 = arith.addf %4, %8 : vector<126x84xf32>
    %10 = vector.extract_strided_slice %0 {offsets = [2, 0], sizes = [126, 64], strides = [1, 1]} : vector<128x64xbf16> to vector<126x64xbf16>
    %c2 = arith.constant 2 : index
    %c0_7 = arith.constant 0 : index
    %c0_8 = arith.constant 0 : index
    %11 = vector.load %arg2[%c2, %c0_7, %c0_8] : memref<3x64x84xbf16, #tpu.memory_space<vmem>>, vector<1x64x84xbf16>
    %12 = vector.shape_cast %11 : vector<1x64x84xbf16> to vector<64x84xbf16>
    %cst_9 = arith.constant dense<0.000000e+00> : vector<126x84xf32>
    %13 = tpu.matmul %10, %12, %cst_9 {dimension_numbers = #tpu.dot_dimension_numbers<[1], [0], [0], [1], [0, 0, 1, 1], [], []>} : vector<126x64xbf16>, vector<64x84xbf16>, vector<126x84xf32> -> vector<126x84xf32>
    %14 = arith.addf %9, %13 : vector<126x84xf32>
    %c0_10 = arith.constant 0 : index
    %c0_11 = arith.constant 0 : index
    %15 = vector.load %arg3[%c0_10, %c0_11] : memref<1x84xf32, #tpu.memory_space<vmem>>, vector<1x84xf32>
    %16 = vector.broadcast %15 : vector<1x84xf32> to vector<126x84xf32>
    %17 = arith.addf %14, %16 : vector<126x84xf32>
    %cst_12 = arith.constant 0.000000e+00 : f32
    %18 = vector.broadcast %cst_12 : f32 to vector<126x84xf32>
    %19 = arith.maximumf %17, %18 : vector<126x84xf32>
    %20 = arith.truncf %19 : vector<126x84xf32> to vector<126x84xbf16>
    %c0_13 = arith.constant 0 : index
    %c0_14 = arith.constant 0 : index
    %c0_15 = arith.constant 0 : index
    %21 = vector.load %arg4[%c0_13, %c0_14, %c0_15] : memref<2x84x42xbf16, #tpu.memory_space<vmem>>, vector<1x84x42xbf16>
    %22 = vector.shape_cast %21 : vector<1x84x42xbf16> to vector<84x42xbf16>
    %cst_16 = arith.constant dense<0.000000e+00> : vector<126x42xf32>
    %23 = tpu.matmul %20, %22, %cst_16 {dimension_numbers = #tpu.dot_dimension_numbers<[1], [0], [0], [1], [0, 0, 1, 1], [], []>} : vector<126x84xbf16>, vector<84x42xbf16>, vector<126x42xf32> -> vector<126x42xf32>
    %c1_17 = arith.constant 1 : index
    %c0_18 = arith.constant 0 : index
    %c0_19 = arith.constant 0 : index
    %24 = vector.load %arg4[%c1_17, %c0_18, %c0_19] : memref<2x84x42xbf16, #tpu.memory_space<vmem>>, vector<1x84x42xbf16>
    %25 = vector.shape_cast %24 : vector<1x84x42xbf16> to vector<84x42xbf16>
    %cst_20 = arith.constant dense<0.000000e+00> : vector<126x42xf32>
    %26 = tpu.matmul %20, %25, %cst_20 {dimension_numbers = #tpu.dot_dimension_numbers<[1], [0], [0], [1], [0, 0, 1, 1], [], []>} : vector<126x84xbf16>, vector<84x42xbf16>, vector<126x42xf32> -> vector<126x42xf32>
    %27 = arith.maximumf %23, %26 : vector<126x42xf32>
    %28 = arith.truncf %27 : vector<126x42xf32> to vector<126x42xbf16>
    %c0_21 = arith.constant 0 : index
    %c0_22 = arith.constant 0 : index
    %c0_23 = arith.constant 0 : index
    %29 = vector.load %arg5[%c0_21, %c0_22, %c0_23] : memref<2x64x126xbf16, #tpu.memory_space<vmem>>, vector<1x64x126xbf16>
    %30 = vector.shape_cast %29 : vector<1x64x126xbf16> to vector<64x126xbf16>
    %cst_24 = arith.constant dense<0.000000e+00> : vector<64x42xf32>
    %31 = tpu.matmul %30, %28, %cst_24 {dimension_numbers = #tpu.dot_dimension_numbers<[1], [0], [0], [1], [0, 0, 1, 1], [], []>} : vector<64x126xbf16>, vector<126x42xbf16>, vector<64x42xf32> -> vector<64x42xf32>
    %c1_25 = arith.constant 1 : index
    %c0_26 = arith.constant 0 : index
    %c0_27 = arith.constant 0 : index
    %32 = vector.load %arg5[%c1_25, %c0_26, %c0_27] : memref<2x64x126xbf16, #tpu.memory_space<vmem>>, vector<1x64x126xbf16>
    %33 = vector.shape_cast %32 : vector<1x64x126xbf16> to vector<64x126xbf16>
    %cst_28 = arith.constant dense<0.000000e+00> : vector<64x42xf32>
    %34 = tpu.matmul %33, %28, %cst_28 {dimension_numbers = #tpu.dot_dimension_numbers<[1], [0], [0], [1], [0, 0, 1, 1], [], []>} : vector<64x126xbf16>, vector<126x42xbf16>, vector<64x42xf32> -> vector<64x42xf32>
    %35 = arith.maximumf %31, %34 : vector<64x42xf32>
    %36 = arith.truncf %35 : vector<64x42xf32> to vector<64x42xbf16>
    %37 = vector.extract_strided_slice %36 {offsets = [0, 0], sizes = [62, 42], strides = [1, 1]} : vector<64x42xbf16> to vector<62x42xbf16>
    %c0_29 = arith.constant 0 : index
    %c0_30 = arith.constant 0 : index
    %c0_31 = arith.constant 0 : index
    %38 = vector.load %arg6[%c0_29, %c0_30, %c0_31] : memref<3x42x80xbf16, #tpu.memory_space<vmem>>, vector<1x42x80xbf16>
    %39 = vector.shape_cast %38 : vector<1x42x80xbf16> to vector<42x80xbf16>
    %cst_32 = arith.constant dense<0.000000e+00> : vector<62x80xf32>
    %40 = tpu.matmul %37, %39, %cst_32 {dimension_numbers = #tpu.dot_dimension_numbers<[1], [0], [0], [1], [0, 0, 1, 1], [], []>} : vector<62x42xbf16>, vector<42x80xbf16>, vector<62x80xf32> -> vector<62x80xf32>
    %41 = vector.extract_strided_slice %36 {offsets = [1, 0], sizes = [62, 42], strides = [1, 1]} : vector<64x42xbf16> to vector<62x42xbf16>
    %c1_33 = arith.constant 1 : index
    %c0_34 = arith.constant 0 : index
    %c0_35 = arith.constant 0 : index
    %42 = vector.load %arg6[%c1_33, %c0_34, %c0_35] : memref<3x42x80xbf16, #tpu.memory_space<vmem>>, vector<1x42x80xbf16>
    %43 = vector.shape_cast %42 : vector<1x42x80xbf16> to vector<42x80xbf16>
    %cst_36 = arith.constant dense<0.000000e+00> : vector<62x80xf32>
    %44 = tpu.matmul %41, %43, %cst_36 {dimension_numbers = #tpu.dot_dimension_numbers<[1], [0], [0], [1], [0, 0, 1, 1], [], []>} : vector<62x42xbf16>, vector<42x80xbf16>, vector<62x80xf32> -> vector<62x80xf32>
    %45 = arith.addf %40, %44 : vector<62x80xf32>
    %46 = vector.extract_strided_slice %36 {offsets = [2, 0], sizes = [62, 42], strides = [1, 1]} : vector<64x42xbf16> to vector<62x42xbf16>
    %c2_37 = arith.constant 2 : index
    %c0_38 = arith.constant 0 : index
    %c0_39 = arith.constant 0 : index
    %47 = vector.load %arg6[%c2_37, %c0_38, %c0_39] : memref<3x42x80xbf16, #tpu.memory_space<vmem>>, vector<1x42x80xbf16>
    %48 = vector.shape_cast %47 : vector<1x42x80xbf16> to vector<42x80xbf16>
    %cst_40 = arith.constant dense<0.000000e+00> : vector<62x80xf32>
    %49 = tpu.matmul %46, %48, %cst_40 {dimension_numbers = #tpu.dot_dimension_numbers<[1], [0], [0], [1], [0, 0, 1, 1], [], []>} : vector<62x42xbf16>, vector<42x80xbf16>, vector<62x80xf32> -> vector<62x80xf32>
    %50 = arith.addf %45, %49 : vector<62x80xf32>
    %c0_41 = arith.constant 0 : index
    %c0_42 = arith.constant 0 : index
    %51 = vector.load %arg7[%c0_41, %c0_42] : memref<1x80xf32, #tpu.memory_space<vmem>>, vector<1x80xf32>
    %52 = vector.broadcast %51 : vector<1x80xf32> to vector<62x80xf32>
    %53 = arith.addf %50, %52 : vector<62x80xf32>
    %cst_43 = arith.constant 0.000000e+00 : f32
    %54 = vector.broadcast %cst_43 : f32 to vector<62x80xf32>
    %55 = arith.maximumf %53, %54 : vector<62x80xf32>
    %56 = arith.truncf %55 : vector<62x80xf32> to vector<62x80xbf16>
    %c0_44 = arith.constant 0 : index
    %c0_45 = arith.constant 0 : index
    %c0_46 = arith.constant 0 : index
    %57 = vector.load %arg8[%c0_44, %c0_45, %c0_46] : memref<2x80x32xbf16, #tpu.memory_space<vmem>>, vector<1x80x32xbf16>
    %58 = vector.shape_cast %57 : vector<1x80x32xbf16> to vector<80x32xbf16>
    %cst_47 = arith.constant dense<0.000000e+00> : vector<62x32xf32>
    %59 = tpu.matmul %56, %58, %cst_47 {dimension_numbers = #tpu.dot_dimension_numbers<[1], [0], [0], [1], [0, 0, 1, 1], [], []>} : vector<62x80xbf16>, vector<80x32xbf16>, vector<62x32xf32> -> vector<62x32xf32>
    %c1_48 = arith.constant 1 : index
    %c0_49 = arith.constant 0 : index
    %c0_50 = arith.constant 0 : index
    %60 = vector.load %arg8[%c1_48, %c0_49, %c0_50] : memref<2x80x32xbf16, #tpu.memory_space<vmem>>, vector<1x80x32xbf16>
    %61 = vector.shape_cast %60 : vector<1x80x32xbf16> to vector<80x32xbf16>
    %cst_51 = arith.constant dense<0.000000e+00> : vector<62x32xf32>
    %62 = tpu.matmul %56, %61, %cst_51 {dimension_numbers = #tpu.dot_dimension_numbers<[1], [0], [0], [1], [0, 0, 1, 1], [], []>} : vector<62x80xbf16>, vector<80x32xbf16>, vector<62x32xf32> -> vector<62x32xf32>
    %63 = arith.maximumf %59, %62 : vector<62x32xf32>
    %64 = arith.truncf %63 : vector<62x32xf32> to vector<62x32xbf16>
    %c0_52 = arith.constant 0 : index
    %c0_53 = arith.constant 0 : index
    %c0_54 = arith.constant 0 : index
    %65 = vector.load %arg9[%c0_52, %c0_53, %c0_54] : memref<4x8x62xbf16, #tpu.memory_space<vmem>>, vector<1x8x62xbf16>
    %66 = vector.shape_cast %65 : vector<1x8x62xbf16> to vector<8x62xbf16>
    %cst_55 = arith.constant dense<0.000000e+00> : vector<8x32xf32>
    %67 = tpu.matmul %66, %64, %cst_55 {dimension_numbers = #tpu.dot_dimension_numbers<[1], [0], [0], [1], [0, 0, 1, 1], [], []>} : vector<8x62xbf16>, vector<62x32xbf16>, vector<8x32xf32> -> vector<8x32xf32>
    %c1_56 = arith.constant 1 : index
    %c0_57 = arith.constant 0 : index
    %c0_58 = arith.constant 0 : index
    %68 = vector.load %arg9[%c1_56, %c0_57, %c0_58] : memref<4x8x62xbf16, #tpu.memory_space<vmem>>, vector<1x8x62xbf16>
    %69 = vector.shape_cast %68 : vector<1x8x62xbf16> to vector<8x62xbf16>
    %cst_59 = arith.constant dense<0.000000e+00> : vector<8x32xf32>
    %70 = tpu.matmul %69, %64, %cst_59 {dimension_numbers = #tpu.dot_dimension_numbers<[1], [0], [0], [1], [0, 0, 1, 1], [], []>} : vector<8x62xbf16>, vector<62x32xbf16>, vector<8x32xf32> -> vector<8x32xf32>
    %71 = arith.maximumf %67, %70 : vector<8x32xf32>
    %72 = arith.truncf %71 : vector<8x32xf32> to vector<8x32xbf16>
    %c0_60 = arith.constant 0 : index
    %c0_61 = arith.constant 0 : index
    %c0_62 = arith.constant 0 : index
    %73 = vector.load %arg10[%c0_60, %c0_61, %c0_62] : memref<2x32x128xbf16, #tpu.memory_space<vmem>>, vector<1x32x128xbf16>
    %74 = vector.shape_cast %73 : vector<1x32x128xbf16> to vector<32x128xbf16>
    %cst_63 = arith.constant dense<0.000000e+00> : vector<8x128xf32>
    %75 = tpu.matmul %72, %74, %cst_63 {dimension_numbers = #tpu.dot_dimension_numbers<[1], [0], [0], [1], [0, 0, 1, 1], [], []>} : vector<8x32xbf16>, vector<32x128xbf16>, vector<8x128xf32> -> vector<8x128xf32>
    %c2_64 = arith.constant 2 : index
    %c0_65 = arith.constant 0 : index
    %c0_66 = arith.constant 0 : index
    %76 = vector.load %arg9[%c2_64, %c0_65, %c0_66] : memref<4x8x62xbf16, #tpu.memory_space<vmem>>, vector<1x8x62xbf16>
    %77 = vector.shape_cast %76 : vector<1x8x62xbf16> to vector<8x62xbf16>
    %cst_67 = arith.constant dense<0.000000e+00> : vector<8x32xf32>
    %78 = tpu.matmul %77, %64, %cst_67 {dimension_numbers = #tpu.dot_dimension_numbers<[1], [0], [0], [1], [0, 0, 1, 1], [], []>} : vector<8x62xbf16>, vector<62x32xbf16>, vector<8x32xf32> -> vector<8x32xf32>
    %c3 = arith.constant 3 : index
    %c0_68 = arith.constant 0 : index
    %c0_69 = arith.constant 0 : index
    %79 = vector.load %arg9[%c3, %c0_68, %c0_69] : memref<4x8x62xbf16, #tpu.memory_space<vmem>>, vector<1x8x62xbf16>
    %80 = vector.shape_cast %79 : vector<1x8x62xbf16> to vector<8x62xbf16>
    %cst_70 = arith.constant dense<0.000000e+00> : vector<8x32xf32>
    %81 = tpu.matmul %80, %64, %cst_70 {dimension_numbers = #tpu.dot_dimension_numbers<[1], [0], [0], [1], [0, 0, 1, 1], [], []>} : vector<8x62xbf16>, vector<62x32xbf16>, vector<8x32xf32> -> vector<8x32xf32>
    %82 = arith.maximumf %78, %81 : vector<8x32xf32>
    %83 = arith.truncf %82 : vector<8x32xf32> to vector<8x32xbf16>
    %c1_71 = arith.constant 1 : index
    %c0_72 = arith.constant 0 : index
    %c0_73 = arith.constant 0 : index
    %84 = vector.load %arg10[%c1_71, %c0_72, %c0_73] : memref<2x32x128xbf16, #tpu.memory_space<vmem>>, vector<1x32x128xbf16>
    %85 = vector.shape_cast %84 : vector<1x32x128xbf16> to vector<32x128xbf16>
    %cst_74 = arith.constant dense<0.000000e+00> : vector<8x128xf32>
    %86 = tpu.matmul %83, %85, %cst_74 {dimension_numbers = #tpu.dot_dimension_numbers<[1], [0], [0], [1], [0, 0, 1, 1], [], []>} : vector<8x32xbf16>, vector<32x128xbf16>, vector<8x128xf32> -> vector<8x128xf32>
    %87 = arith.addf %75, %86 : vector<8x128xf32>
    %c0_75 = arith.constant 0 : index
    %c0_76 = arith.constant 0 : index
    %88 = vector.load %arg11[%c0_75, %c0_76] : memref<1x128xf32, #tpu.memory_space<vmem>>, vector<1x128xf32>
    %89 = vector.broadcast %88 : vector<1x128xf32> to vector<8x128xf32>
    %90 = arith.addf %87, %89 : vector<8x128xf32>
    %cst_77 = arith.constant 0.000000e+00 : f32
    %91 = vector.broadcast %cst_77 : f32 to vector<8x128xf32>
    %92 = arith.maximumf %90, %91 : vector<8x128xf32>
    %93 = arith.truncf %92 : vector<8x128xf32> to vector<8x128xbf16>
    %c0_78 = arith.constant 0 : index
    %c0_79 = arith.constant 0 : index
    %94 = vector.load %arg12[%c0_78, %c0_79] : memref<128x32xbf16, #tpu.memory_space<vmem>>, vector<128x32xbf16>
    %cst_80 = arith.constant dense<0.000000e+00> : vector<8x32xf32>
    %95 = tpu.matmul %93, %94, %cst_80 {dimension_numbers = #tpu.dot_dimension_numbers<[1], [0], [0], [1], [0, 0, 1, 1], [], []>} : vector<8x128xbf16>, vector<128x32xbf16>, vector<8x32xf32> -> vector<8x32xf32>
    %c0_81 = arith.constant 0 : index
    %c0_82 = arith.constant 0 : index
    %96 = vector.load %arg13[%c0_81, %c0_82] : memref<1x32xf32, #tpu.memory_space<vmem>>, vector<1x32xf32>
    %97 = vector.broadcast %96 : vector<1x32xf32> to vector<8x32xf32>
    %98 = arith.addf %95, %97 : vector<8x32xf32>
    %cst_83 = arith.constant 0.000000e+00 : f32
    %99 = vector.broadcast %cst_83 : f32 to vector<8x32xf32>
    %100 = arith.maximumf %98, %99 : vector<8x32xf32>
    %101 = arith.truncf %100 : vector<8x32xf32> to vector<8x32xbf16>
    %c0_84 = arith.constant 0 : index
    %c0_85 = arith.constant 0 : index
    %102 = vector.load %arg14[%c0_84, %c0_85] : memref<32x128xbf16, #tpu.memory_space<vmem>>, vector<32x128xbf16>
    %cst_86 = arith.constant dense<0.000000e+00> : vector<8x128xf32>
    %103 = tpu.matmul %101, %102, %cst_86 {dimension_numbers = #tpu.dot_dimension_numbers<[1], [0], [0], [1], [0, 0, 1, 1], [], []>} : vector<8x32xbf16>, vector<32x128xbf16>, vector<8x128xf32> -> vector<8x128xf32>
    %c0_87 = arith.constant 0 : index
    %c0_88 = arith.constant 0 : index
    %104 = vector.load %arg15[%c0_87, %c0_88] : memref<1x128xf32, #tpu.memory_space<vmem>>, vector<1x128xf32>
    %105 = vector.broadcast %104 : vector<1x128xf32> to vector<8x128xf32>
    %106 = arith.addf %103, %105 : vector<8x128xf32>
    %c0_89 = arith.constant 0 : index
    %c0_90 = arith.constant 0 : index
    %107 = vector.load %arg16[%c0_89, %c0_90] : memref<8x128xf32, #tpu.memory_space<vmem>>, vector<8x128xf32>
    tpu.vector_store %arg16[%c0_89, %c0_90], %106 {strides = array<i32>} : memref<8x128xf32, #tpu.memory_space<vmem>>, vector<8x128xf32>,
    return
  }
  func.func @transform_0(%arg0: i32) -> (i32, i32) {
    %c0_i32 = arith.constant 0 : i32
    %c0_i32_0 = arith.constant 0 : i32
    return %arg0, %c0_i32 : i32, i32
  }
  func.func @transform_1(%arg0: i32) -> (i32, i32, i32) {
    %c0_i32 = arith.constant 0 : i32
    %c0_i32_0 = arith.constant 0 : i32
    %c0_i32_1 = arith.constant 0 : i32
    %c0_i32_2 = arith.constant 0 : i32
    return %c0_i32, %c0_i32_0, %c0_i32_1 : i32, i32, i32
  }
  func.func @transform_2(%arg0: i32) -> (i32, i32) {
    %c0_i32 = arith.constant 0 : i32
    %c0_i32_0 = arith.constant 0 : i32
    %c0_i32_1 = arith.constant 0 : i32
    return %c0_i32, %c0_i32_0 : i32, i32
  }
  func.func @transform_3(%arg0: i32) -> (i32, i32, i32) {
    %c0_i32 = arith.constant 0 : i32
    %c0_i32_0 = arith.constant 0 : i32
    %c0_i32_1 = arith.constant 0 : i32
    %c0_i32_2 = arith.constant 0 : i32
    return %c0_i32, %c0_i32_0, %c0_i32_1 : i32, i32, i32
  }
  func.func @transform_4(%arg0: i32) -> (i32, i32, i32) {
    %c0_i32 = arith.constant 0 : i32
    %c0_i32_0 = arith.constant 0 : i32
    %c0_i32_1 = arith.constant 0 : i32
    %c0_i32_2 = arith.constant 0 : i32
    return %c0_i32, %c0_i32_0, %c0_i32_1 : i32, i32, i32
  }
  func.func @transform_5(%arg0: i32) -> (i32, i32, i32) {
    %c0_i32 = arith.constant 0 : i32
    %c0_i32_0 = arith.constant 0 : i32
    %c0_i32_1 = arith.constant 0 : i32
    %c0_i32_2 = arith.constant 0 : i32
    return %c0_i32, %c0_i32_0, %c0_i32_1 : i32, i32, i32
  }
  func.func @transform_6(%arg0: i32) -> (i32, i32) {
    %c0_i32 = arith.constant 0 : i32
    %c0_i32_0 = arith.constant 0 : i32
    %c0_i32_1 = arith.constant 0 : i32
    return %c0_i32, %c0_i32_0 : i32, i32
  }
  func.func @transform_7(%arg0: i32) -> (i32, i32, i32) {
    %c0_i32 = arith.constant 0 : i32
    %c0_i32_0 = arith.constant 0 : i32
    %c0_i32_1 = arith.constant 0 : i32
    %c0_i32_2 = arith.constant 0 : i32
    return %c0_i32, %c0_i32_0, %c0_i32_1 : i32, i32, i32
  }
  func.func @transform_8(%arg0: i32) -> (i32, i32, i32) {
    %c0_i32 = arith.constant 0 : i32
    %c0_i32_0 = arith.constant 0 : i32
    %c0_i32_1 = arith.constant 0 : i32
    %c0_i32_2 = arith.constant 0 : i32
    return %c0_i32, %c0_i32_0, %c0_i32_1 : i32, i32, i32
  }
  func.func @transform_9(%arg0: i32) -> (i32, i32, i32) {
    %c0_i32 = arith.constant 0 : i32
    %c0_i32_0 = arith.constant 0 : i32
    %c0_i32_1 = arith.constant 0 : i32
    %c0_i32_2 = arith.constant 0 : i32
    return %c0_i32, %c0_i32_0, %c0_i32_1 : i32, i32, i32
  }
  func.func @transform_10(%arg0: i32) -> (i32, i32) {
    %c0_i32 = arith.constant 0 : i32
    %c0_i32_0 = arith.constant 0 : i32
    %c0_i32_1 = arith.constant 0 : i32
    return %c0_i32, %c0_i32_0 : i32, i32
  }
  func.func @transform_11(%arg0: i32) -> (i32, i32) {
    %c0_i32 = arith.constant 0 : i32
    %c0_i32_0 = arith.constant 0 : i32
    %c0_i32_1 = arith.constant 0 : i32
    return %c0_i32, %c0_i32_0 : i32, i32
  }
  func.func @transform_12(%arg0: i32) -> (i32, i32) {
    %c0_i32 = arith.constant 0 : i32
    %c0_i32_0 = arith.constant 0 : i32
    %c0_i32_1 = arith.constant 0 : i32
    return %c0_i32, %c0_i32_0 : i32, i32
  }
  func.func @transform_13(%arg0: i32) -> (i32, i32) {
    %c0_i32 = arith.constant 0 : i32
    %c0_i32_0 = arith.constant 0 : i32
    %c0_i32_1 = arith.constant 0 : i32
    return %c0_i32, %c0_i32_0 : i32, i32
  }
  func.func @transform_14(%arg0: i32) -> (i32, i32) {
    %c0_i32 = arith.constant 0 : i32
    %c0_i32_0 = arith.constant 0 : i32
    %c0_i32_1 = arith.constant 0 : i32
    return %c0_i32, %c0_i32_0 : i32, i32
  }
  func.func @transform_15(%arg0: i32) -> (i32, i32) {
    %c0_i32 = arith.constant 0 : i32
    %c0_i32_0 = arith.constant 0 : i32
    return %arg0, %c0_i32 : i32, i32
  }
}

</mosaic_0001>

<bundles_post_ra>
// kernel: fmdqn_forward.1
= control target key start
LH: loop header
LB: loop body
LE: loop exit
PB: predicated region body
PF: predicated region fallthrough
CT: control target
= control target key end

     0   :  { %vm124_vm0 = vsmask.f32 7424  ;;  %vm384_vm1 = vcmask 1046528   ;;  %vm212_vm2 = vcmask 523264   ;;  %vm626_vm3 = vcmask 1041408   ;;  %s2635_s1 = inlined_call_operand.vmem [shape: bf16[3,64,84], index: 1, kind: input, shape index: {}]   ;;  %s2636_s0 = inlined_call_operand.vmem [shape: bf16[128,64], index: 0, kind: input, shape index: {}]   ;;  %s2637_s2 = inlined_call_operand.vmem [shape: f32[1,84], index: 2, kind: input, shape index: {}]   ;;  %s2638_s3 = inlined_call_operand.vmem [shape: bf16[2,84,42], index: 3, kind: input, shape index: {}]   ;;  %s2639_s4 = inlined_call_operand.vmem [shape: bf16[2,64,126], index: 4, kind: input, shape index: {}]   ;;  %s2640_s5 = inlined_call_operand.vmem [shape: bf16[3,42,80], index: 5, kind: input, shape index: {}]   ;;  %s2641_s6 = inlined_call_operand.vmem [shape: f32[1,80], index: 6, kind: input, shape index: {}]   ;;  %s2642_s7 = inlined_call_operand.vmem [shape: bf16[2,80,32], index: 7, kind: input, shape index: {}]   ;;  %s2643_s8 = inlined_call_operand.vmem [shape: bf16[4,8,62], index: 8, kind: input, shape index: {}]   ;;  %s2644_s9 = inlined_call_operand.vmem [shape: bf16[2,32,128], index: 9, kind: input, shape index: {}]   ;;  %s2645_s11 = inlined_call_operand.vmem [shape: bf16[128,32], index: 11, kind: input, shape index: {}]   ;;  %s2646_s10 = inlined_call_operand.vmem [shape: f32[1,128], index: 10, kind: input, shape index: {}]   ;;  %s2647_s12 = inlined_call_operand.vmem [shape: f32[1,32], index: 12, kind: input, shape index: {}]   ;;  %s2648_s14 = inlined_call_operand.vmem [shape: f32[1,128], index: 14, kind: input, shape index: {}]   ;;  %s2649_s13 = inlined_call_operand.vmem [shape: bf16[32,128], index: 13, kind: input, shape index: {}]   ;;  %s2650_s15 = inlined_call_operand.vmem [shape: f32[8,128], index: 15, kind: output, shape index: {}]  }
   0x1   :  { %v2129_v0 = vld [vmem:[%s2635_s1 + $0x38] sm:$0xff]  ;;  %v2128_v3 = vld [vmem:[%s2635_s1 + $0x30] sm:$0xff]  ;;  %v2114_v6 = vld [vmem:[%s2636_s0] sm:$0xff]  ;;  %vm601_vm4 = vcmask 687104   ;;  %vm828_vm5 = vcmask 1031168   ;;  %vm1054_vm6 = vcmask 1044480  }
   0x2   :  { %v2125_v1 = vld [vmem:[%s2635_s1 + $0x18] sm:$0xff]  ;;  %241 = vmatpush.bf16.msra.mxu0 %v2129_v0  ;;  %v2124_v4 = vld [vmem:[%s2635_s1 + $0x10] sm:$0xff]  ;;  %v2115_v7 = vld [vmem:[%s2636_s0 + $0x8] sm:$0xff]  ;;  %v126_v10 = vshrl.u32 %v2114_v6, 16  ;;  %v128_v11 = vshll.u32 %v2114_v6, 16  ;;  %v385_v20 = vrot.slane %v2114_v6, 1 }
   0x3   :  { %v2133_v2 = vld [vmem:[%s2635_s1 + $0x58] sm:$0xff]  ;;  %330 = vmatpush.bf16.msra.mxu1 %v2125_v1  ;;  %v2132_v5 = vld [vmem:[%s2635_s1 + $0x50] sm:$0xff]  ;;  %v2127_v8 = vld [vmem:[%s2635_s1 + $0x28] sm:$0xff]  ;;  %v133_v12 = vshll.u32 %v2115_v7, 16  ;;  %v386_v21 = vrot.slane %v2115_v7, 1  ;;  %v137_v25 = vshrl.u32 %v2115_v7, 16 }
   0x4   :  { %452 = vmatpush.bf16.msra.mxu2 %v2133_v2  ;;  %v2123_v9 = vld [vmem:[%s2635_s1 + $0x8] sm:$0xff]  ;;  %v130_v14 = vrot.slane %v128_v11, 1  ;;  %v2126_v15 = vld [vmem:[%s2635_s1 + $0x20] sm:$0xff]  ;;  %v2116_v24 = vld [vmem:[%s2636_s0 + $0x10] sm:$0xff]  ;;  %vm1041_vm7 = vcmask 343040   ;;  %vm1291_vm8 = vcmask 654336  }
   0x5   :  { %v2131_v13 = vld [vmem:[%s2635_s1 + $0x48] sm:$0xff]  ;;  %v2122_v16 = vld [vmem:[%s2635_s1] sm:$0xff]  ;;  %v135_v18 = vrot.slane %v133_v12, 1  ;;  %v387_v23 = vsel %vm384_vm1, %v385_v20, %v386_v21  ;;  %v141_v26 = vshll.u32 %v2116_v24, 16  ;;  %v388_v29 = vrot.slane %v2116_v24, 1  ;;  %v2117_v32 = vld [vmem:[%s2636_s0 + $0x18] sm:$0xff] }
   0x6   :  { %242 = vmatpush.bf16.msra.mxu0 %v2128_v3  ;;  %v131_v17 = vor.u32 %v130_v14, %v126_v10  ;;  %v2130_v19 = vld [vmem:[%s2635_s1 + $0x40] sm:$0xff]  ;;  %v145_v33 = vshrl.u32 %v2116_v24, 16  ;;  %v149_v34 = vshll.u32 %v2117_v32, 16  ;;  %v390_v37 = vrot.slane %v2117_v32, 1  ;;  %v2119_v48 = vld [vmem:[%s2636_s0 + $0x28] sm:$0xff]  ;;  %v2120_v56 = vld [vmem:[%s2636_s0 + $0x30] sm:$0xff] }
   0x7   :  { %331 = vmatpush.bf16.msra.mxu1 %v2124_v4  ;;  %v139_v27 = vor.u32 %v137_v25, %v135_v18  ;;  %v143_v28 = vrot.slane %v141_v26, 1  ;;  %v389_v31 = vsel %vm384_vm1, %v386_v21, %v388_v29  ;;  %v2118_v40 = vld [vmem:[%s2636_s0 + $0x20] sm:$0xff]  ;;  %v153_v41 = vshrl.u32 %v2117_v32, 16  ;;  %v2121_v0 = vld [vmem:[%s2636_s0 + $0x38] sm:$0xff]  ;;  %v1849_v1 = vld [vmem:[%s2638_s3 + $0x54] sm:$0x3] }
   0x8   :  { %453 = vmatpush.bf16.msra.mxu2 %v2132_v5  ;;  %v136_v22 = vsel %vm124_vm0, %v131_v17, %v135_v18  ;;  %v151_v36 = vrot.slane %v149_v34, 1  ;;  %v391_v39 = vsel %vm384_vm1, %v388_v29, %v390_v37  ;;  %v157_v42 = vshll.u32 %v2118_v40, 16  ;;  %v2143_v17 = vld [vmem:[%s2638_s3 + $0x4c] sm:$0xff]  ;;  %v2137_v18 = vld [vmem:[%s2638_s3 + $0x18] sm:$0xff]  ;;  %v2134_v26 = vld [vmem:[%s2638_s3] sm:$0xff] }
   0x9   :  { %v144_v30 = vsel %vm124_vm0, %v139_v27, %v143_v28  ;;  %v147_v35 = vor.u32 %v145_v33, %v143_v28  ;;  %v392_v45 = vrot.slane %v2118_v40, 1  ;;  %v161_v49 = vshrl.u32 %v2118_v40, 16  ;;  %v2136_v21 = vld [vmem:[%s2638_s3 + $0x10] sm:$0xff] }
   0xa   :  { %243 = vmatpush.bf16.msra.mxu0 %v2127_v8  ;;  %v155_v43 = vor.u32 %v153_v41, %v151_v36  ;;  %v159_v44 = vrot.slane %v157_v42, 1  ;;  %v165_v50 = vshll.u32 %v2119_v48, 16  ;;  %v394_v53 = vrot.slane %v2119_v48, 1  ;;  %v2140_v25 = vld [vmem:[%s2638_s3 + $0x34] sm:$0xff]  ;;  %v2139_v27 = vld [vmem:[%s2638_s3 + $0x2c] sm:$0xff] }
   0xb   :  { %332 = vmatpush.bf16.msra.mxu1 %v2123_v9  ;;  %v152_v38 = vsel %vm124_vm0, %v147_v35, %v151_v36  ;;  %v393_v47 = vsel %vm384_vm1, %v390_v37, %v392_v45  ;;  %v169_v57 = vshrl.u32 %v2119_v48, 16  ;;  %v173_v58 = vshll.u32 %v2120_v56, 16  ;;  %v2407_v35 = vld [vmem:[%s2637_s2] ss:$0 sm:$0xff] }
   0xc   :  { %454 = vmatpush.bf16.msra.mxu2 %v2131_v13  ;;  %v160_v46 = vsel %vm124_vm0, %v155_v43, %v159_v44  ;;  %v163_v51 = vor.u32 %v161_v49, %v159_v44  ;;  %v167_v52 = vrot.slane %v165_v50, 1  ;;  %v395_v55 = vsel %vm384_vm1, %v392_v45, %v394_v53 }
   0xd   :  { %v175_v60 = vrot.slane %v173_v58, 1  ;;  %v396_v61 = vrot.slane %v2120_v56, 1  ;;  %v712_v2 = vunpack.c.l.b16 %v1849_v1  ;;  %v177_v4 = vshrl.u32 %v2120_v56, 16 }
   0xe   :  { %244 = vmatpush.bf16.msra.mxu0 %v2126_v15  ;;  %v168_v54 = vsel %vm124_vm0, %v163_v51, %v167_v52  ;;  %v171_v59 = vor.u32 %v169_v57, %v167_v52  ;;  %v181_v5 = vshll.u32 %v2121_v0, 16  ;;  %v398_v11 = vrot.slane %v2121_v0, 1 }
   0xf   :  { %333 = vmatpush.bf16.msra.mxu1 %v2122_v16  ;;  %v397_v63 = vsel %vm384_vm1, %v394_v53, %v396_v61  ;;  %v718_v3 = vpack.c.b16 %v712_v2, %v712_v2  ;;  %v179_v8 = vor.u32 %v177_v4, %v175_v60  ;;  %v2138_v16 = vld [vmem:[%s2638_s3 + $0x20] sm:$0xff]  ;;  %v185_v20 = vshrl.u32 %v2121_v0, 16 }
  0x10   :  { %455 = vmatpush.bf16.msra.mxu2 %v2130_v19  ;;  %v176_v62 = vsel %vm124_vm0, %v171_v59, %v175_v60  ;;  %v183_v9 = vrot.slane %v181_v5, 1  ;;  %v399_v15 = vsel %vm384_vm1, %v396_v61, %v398_v11  ;;  %v2142_v19 = vld [vmem:[%s2638_s3 + $0x44] sm:$0xff]  ;;  %vm1416_vm9 = vcmask 506880  }
  0x11   :  { %1747 = vmatmul.msk.bf16.vlgmr.msra.gmra.mxu0 %vm212_vm2, %v136_v22  ;;  %v2141_v22 = vld [vmem:[%s2638_s3 + $0x3c] sm:$0xff]  ;;  %vm1515_vm10 = vcmask 261120  }
  0x12   :  { %1771 = vmatmul.msk.bf16.vlgmr.msra.gmra.mxu1 %vm212_vm2, %v2114_v6  ;;  %v725_v6 = vsel %vm626_vm3, %v718_v3, 0  ;;  %v184_v13 = vsel %vm124_vm0, %v179_v8, %v183_v9 }
  0x13   :  { %1803 = vmatmul.msk.bf16.vlgmr.msra.gmra.mxu2 %vm212_vm2, %v387_v23  ;;  %729 = vmatpush.bf16.msrb.mxu0 %v725_v6  ;;  %v187_v23 = vor.u32 %v185_v20, %v183_v9 }
  0x17   :  { %730 = vmatpush.bf16.msrb.mxu0 %v2143_v17 }
  0x1b   :  { %731 = vmatpush.bf16.msrb.mxu0 %v2142_v19 }
  0x1f   :  { %732 = vmatpush.bf16.msrb.mxu0 %v2141_v22 }
  0x21   :  { %1748 = vmatmul.msk.bf16.gmra.mxu0 %vm212_vm2, %v144_v30 }
  0x22   :  { %1772 = vmatmul.msk.bf16.gmra.mxu1 %vm212_vm2, %v2115_v7  ;;  %v567_v7 = vld [vmem:[%s2638_s3 + $0x28] sm:$0x3] }
  0x23   :  { %1804 = vmatmul.msk.bf16.gmra.mxu2 %vm212_vm2, %v389_v31  ;;  %v589_v10 = vunpack.c.l.b16 %v567_v7  ;;  %733 = vmatpush.bf16.msrb.mxu0 %v2140_v25 }
  0x25   :  { %v595_v12 = vpack.c.b16 %v589_v10, %v589_v10 }
  0x27   :  { %v628_v14 = vsel %vm626_vm3, %v595_v12, 0  ;;  %734 = vmatpush.bf16.msrb.mxu0 %v2139_v27 }
  0x28   :  { %632 = vmatpush.bf16.msra.mxu3 %v628_v14 }
  0x2c   :  { %633 = vmatpush.bf16.msra.mxu3 %v2138_v16 }
  0x30   :  { %634 = vmatpush.bf16.msra.mxu3 %v2137_v18 }
  0x31   :  { %1749 = vmatmul.msk.bf16.gmra.mxu0 %vm212_vm2, %v152_v38 }
  0x32   :  { %1773 = vmatmul.msk.bf16.gmra.mxu1 %vm212_vm2, %v2116_v24  ;;  %v2135_v24 = vld [vmem:[%s2638_s3 + $0x8] sm:$0xff] }
  0x33   :  { %1805 = vmatmul.msk.bf16.gmra.mxu2 %vm212_vm2, %v391_v39 }
  0x34   :  { %635 = vmatpush.bf16.msra.mxu3 %v2136_v21 }
  0x38   :  { %636 = vmatpush.bf16.msra.mxu3 %v2135_v24 }
  0x3c   :  { %637 = vmatpush.bf16.msra.mxu3 %v2134_v26 }
  0x41   :  { %1750 = vmatmul.msk.bf16.gmra.mxu0 %vm212_vm2, %v160_v46 }
  0x42   :  { %1774 = vmatmul.msk.bf16.gmra.mxu1 %vm212_vm2, %v2117_v32 }
  0x43   :  { %1806 = vmatmul.msk.bf16.gmra.mxu2 %vm212_vm2, %v393_v47 }
  0x51   :  { %1751 = vmatmul.msk.bf16.gmra.mxu0 %vm212_vm2, %v168_v54 }
  0x52   :  { %1775 = vmatmul.msk.bf16.gmra.mxu1 %vm212_vm2, %v2118_v40 }
  0x53   :  { %1807 = vmatmul.msk.bf16.gmra.mxu2 %vm212_vm2, %v395_v55 }
  0x61   :  { %1752 = vmatmul.msk.bf16.gmra.mxu0 %vm212_vm2, %v176_v62 }
  0x62   :  { %1776 = vmatmul.msk.bf16.gmra.mxu1 %vm212_vm2, %v2119_v48 }
  0x63   :  { %1808 = vmatmul.msk.bf16.gmra.mxu2 %vm212_vm2, %v397_v63 }
  0x71   :  { %1753 = vmatmul.msk.bf16.gmra.mxu0 %vm212_vm2, %v184_v13 }
  0x72   :  { %1777 = vmatmul.msk.bf16.gmra.mxu1 %vm212_vm2, %v2120_v56 }
  0x73   :  { %1809 = vmatmul.msk.bf16.gmra.mxu2 %vm212_vm2, %v399_v15 }
  0x81   :  { %1754 = vmatmul.msk.bf16.gmra.mxu0 %vm212_vm2, %v187_v23 }
  0x82   :  { %1778 = vmatmul.msk.bf16.gmra.mxu1 %vm212_vm2, %v2121_v0 }
  0x83   :  { %1810 = vmatmul.msk.bf16.gmra.mxu2 %vm212_vm2, %v398_v11 }
  0x8e   :  { %v246_v28 = vpop.f32.mrf.mxu0 }
  0x8f   :  { %v335_v29 = vpop.f32.mrf.mxu1 }
  0x90   :  { %v336_v31 = vadd.f32 %v335_v29, %v246_v28 }
  0x96   :  { %v457_v30 = vpop.f32.mrf.mxu2  ;;  %v248_v32 = vpop.f32.mrf.mxu0 }
  0x97   :  { %v337_v33 = vpop.f32.mrf.mxu1  ;;  %v497_v34 = vadd.f32 %v457_v30, %v336_v31 }
  0x98   :  { %v338_v36 = vadd.f32 %v337_v33, %v248_v32 }
  0x99   :  { %v517_v38 = vadd.f32 %v2407_v35, %v497_v34 }
  0x9b   :  { %v533_v43 = vmax.f32 %v517_v38, 0.0 }
  0x9e   :  { %v459_v37 = vpop.f32.mrf.mxu2  ;;  %v251_v40 = vpop.f32.mrf.mxu0 }
  0x9f   :  { %v498_v39 = vadd.f32 %v459_v37, %v338_v36  ;;  %v340_v41 = vpop.f32.mrf.mxu1 }
  0xa0   :  { %v341_v47 = vadd.f32 %v340_v41, %v251_v40 }
  0xa1   :  { %v518_v42 = vadd.f32 %v2407_v35, %v498_v39 }
  0xa3   :  { %v534_v44 = vmax.f32 %v518_v42, 0.0 }
  0xa5   :  { %v549_v45 = vpack.c.bf16 %v534_v44, %v533_v43 }
  0xa6   :  { %v462_v46 = vpop.f32.mrf.mxu2  ;;  %v253_v48 = vpop.f32.mrf.mxu0 }
  0xa7   :  { %1831 = vmatmul.msk.bf16.vlgmr.msra.gmra.mxu3 %vm601_vm4, %v549_v45  ;;  %1870 = vmatmul.msk.bf16.vlgmr.msrb.gmra.mxu0 %vm601_vm4, %v549_v45  ;;  %v342_v49 = vpop.f32.mrf.mxu1  ;;  %v499_v50 = vadd.f32 %v462_v46, %v341_v47 }
  0xa8   :  { %v343_v51 = vadd.f32 %v342_v49, %v253_v48 }
  0xa9   :  { %v519_v53 = vadd.f32 %v2407_v35, %v499_v50 }
  0xab   :  { %v535_v58 = vmax.f32 %v519_v53, 0.0 }
  0xae   :  { %v464_v52 = vpop.f32.mrf.mxu2  ;;  %v256_v55 = vpop.f32.mrf.mxu0 }
  0xaf   :  { %v500_v54 = vadd.f32 %v464_v52, %v343_v51  ;;  %v345_v56 = vpop.f32.mrf.mxu1 }
  0xb0   :  { %v346_v62 = vadd.f32 %v345_v56, %v256_v55 }
  0xb1   :  { %v520_v57 = vadd.f32 %v2407_v35, %v500_v54 }
  0xb3   :  { %v536_v59 = vmax.f32 %v520_v57, 0.0 }
  0xb5   :  { %v550_v60 = vpack.c.bf16 %v536_v59, %v535_v58 }
  0xb6   :  { %v467_v61 = vpop.f32.mrf.mxu2  ;;  %v258_v63 = vpop.f32.mrf.mxu0 }
  0xb7   :  { %1832 = vmatmul.msk.bf16.gmra.mxu3 %vm601_vm4, %v550_v60  ;;  %1871 = vmatmul.msk.bf16.gmra.mxu0 %vm601_vm4, %v550_v60  ;;  %v347_v0 = vpop.f32.mrf.mxu1  ;;  %v501_v1 = vadd.f32 %v467_v61, %v346_v62 }
  0xb8   :  { %v348_v2 = vadd.f32 %v347_v0, %v258_v63 }
  0xb9   :  { %v521_v4 = vadd.f32 %v2407_v35, %v501_v1 }
  0xbb   :  { %v537_v9 = vmax.f32 %v521_v4, 0.0 }
  0xbe   :  { %v469_v3 = vpop.f32.mrf.mxu2  ;;  %v261_v6 = vpop.f32.mrf.mxu0 }
  0xbf   :  { %v502_v5 = vadd.f32 %v469_v3, %v348_v2  ;;  %v350_v7 = vpop.f32.mrf.mxu1 }
  0xc0   :  { %v351_v13 = vadd.f32 %v350_v7, %v261_v6 }
  0xc1   :  { %v522_v8 = vadd.f32 %v2407_v35, %v502_v5 }
  0xc3   :  { %v538_v10 = vmax.f32 %v522_v8, 0.0 }
  0xc5   :  { %v551_v11 = vpack.c.bf16 %v538_v10, %v537_v9 }
  0xc6   :  { %v472_v12 = vpop.f32.mrf.mxu2  ;;  %v263_v14 = vpop.f32.mrf.mxu0 }
  0xc7   :  { %1833 = vmatmul.msk.bf16.gmra.mxu3 %vm601_vm4, %v551_v11  ;;  %1872 = vmatmul.msk.bf16.gmra.mxu0 %vm601_vm4, %v551_v11  ;;  %v352_v15 = vpop.f32.mrf.mxu1  ;;  %v503_v16 = vadd.f32 %v472_v12, %v351_v13 }
  0xc8   :  { %v353_v17 = vadd.f32 %v352_v15, %v263_v14 }
  0xc9   :  { %v523_v19 = vadd.f32 %v2407_v35, %v503_v16 }
  0xcb   :  { %v539_v24 = vmax.f32 %v523_v19, 0.0 }
  0xce   :  { %v474_v18 = vpop.f32.mrf.mxu2  ;;  %v266_v21 = vpop.f32.mrf.mxu0 }
  0xcf   :  { %v504_v20 = vadd.f32 %v474_v18, %v353_v17  ;;  %v355_v22 = vpop.f32.mrf.mxu1 }
  0xd0   :  { %v356_v28 = vadd.f32 %v355_v22, %v266_v21 }
  0xd1   :  { %v524_v23 = vadd.f32 %v2407_v35, %v504_v20 }
  0xd3   :  { %v540_v25 = vmax.f32 %v524_v23, 0.0 }
  0xd5   :  { %v552_v26 = vpack.c.bf16 %v540_v25, %v539_v24 }
  0xd6   :  { %v477_v27 = vpop.f32.mrf.mxu2  ;;  %v268_v29 = vpop.f32.mrf.mxu0 }
  0xd7   :  { %1834 = vmatmul.msk.bf16.gmra.mxu3 %vm601_vm4, %v552_v26  ;;  %1873 = vmatmul.msk.bf16.gmra.mxu0 %vm601_vm4, %v552_v26  ;;  %v357_v30 = vpop.f32.mrf.mxu1  ;;  %v505_v31 = vadd.f32 %v477_v27, %v356_v28 }
  0xd8   :  { %v358_v32 = vadd.f32 %v357_v30, %v268_v29 }
  0xd9   :  { %v525_v34 = vadd.f32 %v2407_v35, %v505_v31 }
  0xdb   :  { %v541_v40 = vmax.f32 %v525_v34, 0.0 }
  0xde   :  { %v479_v33 = vpop.f32.mrf.mxu2  ;;  %v271_v37 = vpop.f32.mrf.mxu0 }
  0xdf   :  { %v506_v36 = vadd.f32 %v479_v33, %v358_v32  ;;  %v360_v38 = vpop.f32.mrf.mxu1 }
  0xe0   :  { %v361_v44 = vadd.f32 %v360_v38, %v271_v37 }
  0xe1   :  { %v526_v39 = vadd.f32 %v2407_v35, %v506_v36 }
  0xe3   :  { %v542_v41 = vmax.f32 %v526_v39, 0.0 }
  0xe5   :  { %v553_v42 = vpack.c.bf16 %v542_v41, %v541_v40 }
  0xe6   :  { %v482_v43 = vpop.f32.mrf.mxu2  ;;  %v273_v45 = vpop.f32.mrf.mxu0 }
  0xe7   :  { %1835 = vmatmul.msk.bf16.gmra.mxu3 %vm601_vm4, %v553_v42  ;;  %1874 = vmatmul.msk.bf16.gmra.mxu0 %vm601_vm4, %v553_v42  ;;  %v362_v46 = vpop.f32.mrf.mxu1  ;;  %v507_v47 = vadd.f32 %v482_v43, %v361_v44 }
  0xe8   :  { %v363_v48 = vadd.f32 %v362_v46, %v273_v45 }
  0xe9   :  { %v527_v50 = vadd.f32 %v2407_v35, %v507_v47 }
  0xeb   :  { %v543_v55 = vmax.f32 %v527_v50, 0.0 }
  0xee   :  { %v484_v49 = vpop.f32.mrf.mxu2  ;;  %v276_v52 = vpop.f32.mrf.mxu0 }
  0xef   :  { %v508_v51 = vadd.f32 %v484_v49, %v363_v48  ;;  %v365_v53 = vpop.f32.mrf.mxu1 }
  0xf0   :  { %v366_v59 = vadd.f32 %v365_v53, %v276_v52 }
  0xf1   :  { %v528_v54 = vadd.f32 %v2407_v35, %v508_v51 }
  0xf3   :  { %v544_v56 = vmax.f32 %v528_v54, 0.0 }
  0xf5   :  { %v554_v57 = vpack.c.bf16 %v544_v56, %v543_v55 }
  0xf6   :  { %v487_v58 = vpop.f32.mrf.mxu2  ;;  %v278_v60 = vpop.f32.mrf.mxu0 }
  0xf7   :  { %1836 = vmatmul.msk.bf16.gmra.mxu3 %vm601_vm4, %v554_v57  ;;  %1875 = vmatmul.msk.bf16.gmra.mxu0 %vm601_vm4, %v554_v57  ;;  %v367_v61 = vpop.f32.mrf.mxu1  ;;  %v509_v62 = vadd.f32 %v487_v58, %v366_v59 }
  0xf8   :  { %v368_v63 = vadd.f32 %v367_v61, %v278_v60 }
  0xf9   :  { %v529_v1 = vadd.f32 %v2407_v35, %v509_v62 }
  0xfb   :  { %v545_v6 = vmax.f32 %v529_v1, 0.0 }
  0xfe   :  { %v489_v0 = vpop.f32.mrf.mxu2  ;;  %v281_v3 = vpop.f32.mrf.mxu0 }
  0xff   :  { %v510_v2 = vadd.f32 %v489_v0, %v368_v63  ;;  %v370_v4 = vpop.f32.mrf.mxu1 }
 0x100   :  { %v371_v10 = vadd.f32 %v370_v4, %v281_v3 }
 0x101   :  { %v530_v5 = vadd.f32 %v2407_v35, %v510_v2 }
 0x103   :  { %v546_v7 = vmax.f32 %v530_v5, 0.0 }
 0x105   :  { %v555_v8 = vpack.c.bf16 %v546_v7, %v545_v6 }
 0x106   :  { %v492_v9 = vpop.f32.mrf.mxu2  ;;  %v283_v11 = vpop.f32.mrf.mxu0 }
 0x107   :  { %1837 = vmatmul.msk.bf16.gmra.mxu3 %vm601_vm4, %v555_v8  ;;  %1876 = vmatmul.msk.bf16.gmra.mxu0 %vm601_vm4, %v555_v8  ;;  %v372_v12 = vpop.f32.mrf.mxu1  ;;  %v511_v13 = vadd.f32 %v492_v9, %v371_v10 }
 0x108   :  { %v373_v14 = vadd.f32 %v372_v12, %v283_v11 }
 0x109   :  { %v531_v16 = vadd.f32 %v2407_v35, %v511_v13 }
 0x10b   :  { %v547_v19 = vmax.f32 %v531_v16, 0.0  ;;  %v2144_v16 = vld [vmem:[%s2639_s4] sm:$0xff] }
 0x10e   :  { %v494_v15 = vpop.f32.mrf.mxu2 }
 0x10f   :  { %v512_v17 = vadd.f32 %v494_v15, %v373_v14  ;;  %v2148_v15 = vld [vmem:[%s2639_s4 + $0x20] sm:$0xff] }
 0x111   :  { %v532_v18 = vadd.f32 %v2407_v35, %v512_v17  ;;  %v2149_v17 = vld [vmem:[%s2639_s4 + $0x28] sm:$0xff] }
 0x113   :  { %v548_v20 = vmax.f32 %v532_v18, 0.0  ;;  %v2145_v18 = vld [vmem:[%s2639_s4 + $0x8] sm:$0xff] }
 0x115   :  { %v556_v21 = vpack.c.bf16 %v548_v20, %v547_v19  ;;  %v2150_v19 = vld [vmem:[%s2639_s4 + $0x30] sm:$0xff] }
 0x116   :  { %v2146_v20 = vld [vmem:[%s2639_s4 + $0x10] sm:$0xff] }
 0x117   :  { %1838 = vmatmul.msk.bf16.gmra.mxu3 %vm601_vm4, %v556_v21  ;;  %1877 = vmatmul.msk.bf16.gmra.mxu0 %vm601_vm4, %v556_v21  ;;  %v2151_v21 = vld [vmem:[%s2639_s4 + $0x38] sm:$0xff] }
 0x124   :  { %v736_v22 = vpop.f32.mrf.mxu0 }
 0x12a   :  { %v639_v23 = vpop.f32.mrf.mxu3 }
 0x12b   :  { %v776_v24 = vmax.f32 %v639_v23, %v736_v22  ;;  %v2147_v22 = vld [vmem:[%s2639_s4 + $0x18] sm:$0xff]  ;;  %v1958_v23 = vld [vmem:[%s2640_s5 + $0x10] sm:$0xf] }
 0x12c   :  { %v738_v25 = vpop.f32.mrf.mxu0 }
 0x132   :  { %v641_v26 = vpop.f32.mrf.mxu3 }
 0x133   :  { %v777_v27 = vmax.f32 %v641_v26, %v738_v25  ;;  %v1942_v26 = vld [vmem:[%s2640_s5 + $0x28] sm:$0xf] }
 0x134   :  { %v741_v28 = vpop.f32.mrf.mxu0 }
 0x135   :  { %v2441_v29 = vpack.c.bf16 %v777_v27, %v776_v24  ;;  %v2154_v24 = vld [vmem:[%s2640_s5 + $0x10] sm:$0x10]  ;;  %v2157_v27 = vld [vmem:[%s2640_s5 + $0x28] sm:$0x10] }
 0x136   :  { %v1959_v25 = vor.u32 %v2154_v24, %v1958_v23 }
 0x13a   :  { %v644_v30 = vpop.f32.mrf.mxu3 }
 0x13b   :  { %v778_v31 = vmax.f32 %v644_v30, %v741_v28  ;;  %v1113_v28 = vsel %vm1054_vm6, %v1959_v25, 0 }
 0x13c   :  { %v743_v32 = vpop.f32.mrf.mxu0 }
 0x142   :  { %v646_v35 = vpop.f32.mrf.mxu3 }
 0x143   :  { %v779_v33 = vmax.f32 %v646_v35, %v743_v32  ;;  %v2152_v32 = vld [vmem:[%s2640_s5] sm:$0xff] }
 0x144   :  { %v746_v34 = vpop.f32.mrf.mxu0  ;;  %v1980_v35 = vld [vmem:[%s2640_s5 + $0x40] sm:$0xf] }
 0x145   :  { %v793_v36 = vpack.c.bf16 %v779_v33, %v778_v31  ;;  %v2153_v31 = vld [vmem:[%s2640_s5 + $0x8] sm:$0xff]  ;;  %v2160_v33 = vld [vmem:[%s2640_s5 + $0x40] sm:$0x10] }
 0x14a   :  { %v649_v37 = vpop.f32.mrf.mxu3 }
 0x14b   :  { %v780_v38 = vmax.f32 %v649_v37, %v746_v34  ;;  %v1981_v34 = vor.u32 %v2160_v33, %v1980_v35 }
 0x14c   :  { %v748_v39 = vpop.f32.mrf.mxu0 }
 0x152   :  { %v651_v40 = vpop.f32.mrf.mxu3 }
 0x153   :  { %v781_v41 = vmax.f32 %v651_v40, %v748_v39  ;;  %v2156_v39 = vld [vmem:[%s2640_s5 + $0x20] sm:$0xff]  ;;  %v2158_v40 = vld [vmem:[%s2640_s5 + $0x30] sm:$0xff] }
 0x154   :  { %v751_v42 = vpop.f32.mrf.mxu0 }
 0x155   :  { %v794_v43 = vpack.c.bf16 %v781_v41, %v780_v38  ;;  %v2159_v38 = vld [vmem:[%s2640_s5 + $0x38] sm:$0xff] }
 0x15a   :  { %v654_v44 = vpop.f32.mrf.mxu3 }
 0x15b   :  { %v782_v45 = vmax.f32 %v654_v44, %v751_v42  ;;  %v2155_v42 = vld [vmem:[%s2640_s5 + $0x18] sm:$0xff] }
 0x15c   :  { %v753_v46 = vpop.f32.mrf.mxu0 }
 0x162   :  { %v656_v47 = vpop.f32.mrf.mxu3 }
 0x163   :  { %v783_v48 = vmax.f32 %v656_v47, %v753_v46 }
 0x164   :  { %v756_v49 = vpop.f32.mrf.mxu0 }
 0x165   :  { %v795_v50 = vpack.c.bf16 %v783_v48, %v782_v45 }
 0x16a   :  { %v659_v51 = vpop.f32.mrf.mxu3 }
 0x16b   :  { %v784_v52 = vmax.f32 %v659_v51, %v756_v49 }
 0x16c   :  { %v758_v53 = vpop.f32.mrf.mxu0 }
 0x172   :  { %v661_v54 = vpop.f32.mrf.mxu3 }
 0x173   :  { %v785_v12 = vmax.f32 %v661_v54, %v758_v53 }
 0x174   :  { %v761_v55 = vpop.f32.mrf.mxu0 }
 0x175   :  { %v796_v14 = vpack.c.bf16 %v785_v12, %v784_v52 }
 0x17a   :  { %v664_v56 = vpop.f32.mrf.mxu3 }
 0x17b   :  { %v786_v11 = vmax.f32 %v664_v56, %v761_v55 }
 0x17c   :  { %v763_v57 = vpop.f32.mrf.mxu0 }
 0x182   :  { %v666_v58 = vpop.f32.mrf.mxu3 }
 0x183   :  { %v787_v9 = vmax.f32 %v666_v58, %v763_v57 }
 0x184   :  { %v766_v59 = vpop.f32.mrf.mxu0 }
 0x185   :  { %v797_v13 = vpack.c.bf16 %v787_v9, %v786_v11 }
 0x18a   :  { %v669_v60 = vpop.f32.mrf.mxu3 }
 0x18b   :  { %v788_v8 = vmax.f32 %v669_v60, %v766_v59 }
 0x18c   :  { %v768_v61 = vpop.f32.mrf.mxu0 }
 0x192   :  { %v671_v62 = vpop.f32.mrf.mxu3 }
 0x193   :  { %v789_v6 = vmax.f32 %v671_v62, %v768_v61 }
 0x194   :  { %v771_v63 = vpop.f32.mrf.mxu0 }
 0x195   :  { %v798_v10 = vpack.c.bf16 %v789_v6, %v788_v8 }
 0x19a   :  { %v674_v0 = vpop.f32.mrf.mxu3 }
 0x19b   :  { %v790_v3 = vmax.f32 %v674_v0, %v771_v63 }
 0x19c   :  { %v773_v1 = vpop.f32.mrf.mxu0 }
 0x1a2   :  { %v676_v2 = vpop.f32.mrf.mxu3 }
 0x1a3   :  { %v791_v4 = vmax.f32 %v676_v2, %v773_v1 }
 0x1a5   :  { %v799_v5 = vpack.c.bf16 %v791_v4, %v790_v3 }
 0x1a7   :  { %v843_v7 = vsel %vm384_vm1, %v799_v5, 0 }
 0x1a8   :  { %845 = vmatpush.bf16.msrb.mxu1 %v843_v7  ;;  %915 = vmatpush.bf16.msrb.mxu2 %v843_v7 }
 0x1ac   :  { %846 = vmatpush.bf16.msrb.mxu1 %v798_v10  ;;  %916 = vmatpush.bf16.msrb.mxu2 %v798_v10 }
 0x1b0   :  { %847 = vmatpush.bf16.msrb.mxu1 %v797_v13  ;;  %917 = vmatpush.bf16.msrb.mxu2 %v797_v13 }
 0x1b4   :  { %848 = vmatpush.bf16.msrb.mxu1 %v796_v14  ;;  %918 = vmatpush.bf16.msrb.mxu2 %v796_v14 }
 0x1b8   :  { %849 = vmatpush.bf16.msrb.mxu1 %v795_v50  ;;  %919 = vmatpush.bf16.msrb.mxu2 %v795_v50 }
 0x1bc   :  { %850 = vmatpush.bf16.msrb.mxu1 %v794_v43  ;;  %920 = vmatpush.bf16.msrb.mxu2 %v794_v43 }
 0x1c0   :  { %851 = vmatpush.bf16.msrb.mxu1 %v793_v36  ;;  %921 = vmatpush.bf16.msrb.mxu2 %v793_v36  ;;  %v1188_v36 = vsel %vm1054_vm6, %v1981_v34, 0 }
 0x1c4   :  { %852 = vmatpush.bf16.msrb.mxu1 %v2441_v29  ;;  %922 = vmatpush.bf16.msrb.mxu2 %v2441_v29  ;;  %v1943_v29 = vor.u32 %v2157_v27, %v1942_v26 }
 0x1c6   :  { %v1056_v30 = vsel %vm1054_vm6, %v1943_v29, 0 }
 0x1c7   :  { %1922 = vmatmul.msk.bf16.vlgmr.msrb.gmra.mxu2 %vm828_vm5, %v2148_v15  ;;  %1894 = vmatmul.msk.bf16.vlgmr.msrb.gmra.mxu1 %vm828_vm5, %v2144_v16 }
 0x1c8   :  { %1120 = vmatpush.bf16.msra.mxu1 %v1113_v28  ;;  %1063 = vmatpush.bf16.msrb.mxu3 %v1056_v30  ;;  %v2170_v30 = vld [vmem:[%s2642_s7 + $0x48] sm:$0xff] }
 0x1c9   :  { %1195 = vmatpush.bf16.msra.mxu2 %v1188_v36  ;;  %1377 = vmatpush.bf16.msra.mxu0 %v2170_v30 }
 0x1cc   :  { %1121 = vmatpush.bf16.msra.mxu1 %v2153_v31  ;;  %1064 = vmatpush.bf16.msrb.mxu3 %v2156_v39 }
 0x1cd   :  { %1196 = vmatpush.bf16.msra.mxu2 %v2159_v38 }
 0x1d0   :  { %1122 = vmatpush.bf16.msra.mxu1 %v2152_v32  ;;  %1065 = vmatpush.bf16.msrb.mxu3 %v2155_v42 }
 0x1d1   :  { %1197 = vmatpush.bf16.msra.mxu2 %v2158_v40 }
 0x1d7   :  { %1923 = vmatmul.msk.bf16.gmra.mxu2 %vm828_vm5, %v2149_v17  ;;  %1895 = vmatmul.msk.bf16.gmra.mxu1 %vm828_vm5, %v2145_v18 }
 0x1e7   :  { %1924 = vmatmul.msk.bf16.gmra.mxu2 %vm828_vm5, %v2150_v19  ;;  %1896 = vmatmul.msk.bf16.gmra.mxu1 %vm828_vm5, %v2146_v20 }
 0x1f7   :  { %1925 = vmatmul.msk.bf16.gmra.mxu2 %vm828_vm5, %v2151_v21  ;;  %1897 = vmatmul.msk.bf16.gmra.mxu1 %vm828_vm5, %v2147_v22 }
 0x244   :  { %v854_v37 = vpop.f32.mrf.mxu1 }
 0x24a   :  { %v924_v41 = vpop.f32.mrf.mxu2 }
 0x24b   :  { %v944_v44 = vmax.f32 %v854_v37, %v924_v41 }
 0x24c   :  { %v856_v43 = vpop.f32.mrf.mxu1 }
 0x24d   :  { %v952_v46 = vpack.c.bf16 %v944_v44, %v944_v44 }
 0x24f   :  { %v981_v50 = vunpack.c.l.b16 %v952_v46 }
 0x252   :  { %v926_v45 = vpop.f32.mrf.mxu2 }
 0x253   :  { %v945_v47 = vmax.f32 %v856_v43, %v926_v45 }
 0x254   :  { %v859_v48 = vpop.f32.mrf.mxu1 }
 0x255   :  { %v953_v49 = vpack.c.bf16 %v945_v47, %v945_v47 }
 0x257   :  { %v982_v51 = vunpack.c.l.b16 %v953_v49  ;;  %v2164_v49 = vld [vmem:[%s2642_s7 + $0x18] sm:$0xff] }
 0x259   :  { %v989_v52 = vpack.c.b16 %v982_v51, %v981_v50  ;;  %v2169_v50 = vld [vmem:[%s2642_s7 + $0x40] sm:$0xff]  ;;  %v2163_v51 = vld [vmem:[%s2642_s7 + $0x10] sm:$0xff] }
 0x25a   :  { %v929_v53 = vpop.f32.mrf.mxu2  ;;  %1378 = vmatpush.bf16.msra.mxu0 %v2169_v50 }
 0x25b   :  { %1960 = vmatmul.msk.bf16.vlgmr.msra.gmra.mxu1 %vm1041_vm7, %v989_v52  ;;  %v946_v55 = vmax.f32 %v859_v48, %v929_v53  ;;  %v996_v61 = vshll.u32 %v989_v52, 16  ;;  %v1151_v3 = vrot.slane %v989_v52, 1  ;;  %v994_v5 = vshrl.u32 %v989_v52, 16  ;;  %v2165_v48 = vld [vmem:[%s2642_s7 + $0x20] sm:$0xff]  ;;  %v2168_v52 = vld [vmem:[%s2642_s7 + $0x38] sm:$0xff]  ;;  %v2162_v53 = vld [vmem:[%s2642_s7 + $0x8] sm:$0xff] }
 0x25c   :  { %v861_v54 = vpop.f32.mrf.mxu1  ;;  %1307 = vmatpush.bf16.msra.mxu3 %v2165_v48 }
 0x25d   :  { %v954_v57 = vpack.c.bf16 %v946_v55, %v946_v55  ;;  %v998_v1 = vrot.slane %v996_v61, 1  ;;  %v2161_v55 = vld [vmem:[%s2642_s7] sm:$0xff] }
 0x25e   :  { %1379 = vmatpush.bf16.msra.mxu0 %v2168_v52 }
 0x25f   :  { %v983_v62 = vunpack.c.l.b16 %v954_v57  ;;  %v999_v7 = vor.u32 %v998_v1, %v994_v5  ;;  %v2186_v1 = vld [vmem:[%s2641_s6] ss:$0 sm:$0xff] }
 0x260   :  { %1308 = vmatpush.bf16.msra.mxu3 %v2164_v49 }
 0x262   :  { %v931_v56 = vpop.f32.mrf.mxu2 }
 0x263   :  { %v947_v58 = vmax.f32 %v861_v54, %v931_v56  ;;  %v2167_v54 = vld [vmem:[%s2642_s7 + $0x30] sm:$0xff]  ;;  %v2166_v56 = vld [vmem:[%s2642_s7 + $0x28] sm:$0xff] }
 0x264   :  { %v864_v59 = vpop.f32.mrf.mxu1  ;;  %1309 = vmatpush.bf16.msra.mxu3 %v2163_v51  ;;  %1380 = vmatpush.bf16.msra.mxu0 %v2167_v54 }
 0x265   :  { %v955_v60 = vpack.c.bf16 %v947_v58, %v947_v58 }
 0x267   :  { %v984_v63 = vunpack.c.l.b16 %v955_v60 }
 0x268   :  { %1310 = vmatpush.bf16.msra.mxu3 %v2162_v53  ;;  %1381 = vmatpush.bf16.msra.mxu0 %v2166_v56 }
 0x269   :  { %v990_v0 = vpack.c.b16 %v984_v63, %v983_v62 }
 0x26a   :  { %v934_v2 = vpop.f32.mrf.mxu2 }
 0x26b   :  { %v1152_v4 = vrot.slane %v990_v0, 1  ;;  %v1001_v6 = vshll.u32 %v990_v0, 16  ;;  %1961 = vmatmul.msk.bf16.gmra.mxu1 %vm1041_vm7, %v990_v0  ;;  %v948_v11 = vmax.f32 %v864_v59, %v934_v2  ;;  %v1005_v22 = vshrl.u32 %v990_v0, 16 }
 0x26c   :  { %v866_v10 = vpop.f32.mrf.mxu1  ;;  %1311 = vmatpush.bf16.msra.mxu3 %v2161_v55 }
 0x26d   :  { %v1003_v8 = vrot.slane %v1001_v6, 1  ;;  %v1153_v9 = vsel %vm384_vm1, %v1151_v3, %v1152_v4  ;;  %v956_v14 = vpack.c.bf16 %v948_v11, %v948_v11 }
 0x26e   :  { %1982 = vmatmul.msk.bf16.vlgmr.msra.gmra.mxu2 %vm1041_vm7, %v1153_v9 }
 0x26f   :  { %v1004_v12 = vsel %vm124_vm0, %v999_v7, %v1003_v8  ;;  %v985_v17 = vunpack.c.l.b16 %v956_v14  ;;  %v1007_v25 = vor.u32 %v1005_v22, %v1003_v8 }
 0x270   :  { %1944 = vmatmul.msk.bf16.vlgmr.msrb.gmra.mxu3 %vm1041_vm7, %v1004_v12 }
 0x272   :  { %v936_v13 = vpop.f32.mrf.mxu2 }
 0x273   :  { %v949_v15 = vmax.f32 %v866_v10, %v936_v13 }
 0x274   :  { %v869_v19 = vpop.f32.mrf.mxu1 }
 0x275   :  { %v957_v16 = vpack.c.bf16 %v949_v15, %v949_v15 }
 0x277   :  { %v986_v18 = vunpack.c.l.b16 %v957_v16 }
 0x279   :  { %v991_v20 = vpack.c.b16 %v986_v18, %v985_v17 }
 0x27a   :  { %v939_v21 = vpop.f32.mrf.mxu2 }
 0x27b   :  { %v1009_v23 = vshll.u32 %v991_v20, 16  ;;  %v1154_v24 = vrot.slane %v991_v20, 1  ;;  %1962 = vmatmul.msk.bf16.gmra.mxu1 %vm1041_vm7, %v991_v20  ;;  %v950_v28 = vmax.f32 %v869_v19, %v939_v21  ;;  %v1013_v39 = vshrl.u32 %v991_v20, 16 }
 0x27c   :  { %v871_v31 = vpop.f32.mrf.mxu1 }
 0x27d   :  { %v1011_v26 = vrot.slane %v1009_v23, 1  ;;  %v1155_v27 = vsel %vm384_vm1, %v1152_v4, %v1154_v24  ;;  %v958_v35 = vpack.c.bf16 %v950_v28, %v950_v28 }
 0x27e   :  { %1983 = vmatmul.msk.bf16.gmra.mxu2 %vm1041_vm7, %v1155_v27 }
 0x27f   :  { %v1012_v29 = vsel %vm124_vm0, %v1007_v25, %v1011_v26  ;;  %v987_v36 = vunpack.c.l.b16 %v958_v35  ;;  %v1015_v42 = vor.u32 %v1013_v39, %v1011_v26 }
 0x280   :  { %1945 = vmatmul.msk.bf16.gmra.mxu3 %vm1041_vm7, %v1012_v29 }
 0x282   :  { %v941_v32 = vpop.f32.mrf.mxu2 }
 0x283   :  { %v951_v33 = vmax.f32 %v871_v31, %v941_v32 }
 0x285   :  { %v959_v34 = vpack.c.bf16 %v951_v33, %v951_v33 }
 0x287   :  { %v988_v37 = vunpack.c.l.b16 %v959_v34 }
 0x289   :  { %v992_v38 = vpack.c.b16 %v988_v37, %v987_v36 }
 0x28b   :  { %v1017_v40 = vshll.u32 %v992_v38, 16  ;;  %v1156_v41 = vrot.slane %v992_v38, 1  ;;  %1963 = vmatmul.msk.bf16.gmra.mxu1 %vm1041_vm7, %v992_v38  ;;  %v1021_v46 = vshrl.u32 %v992_v38, 16 }
 0x28d   :  { %v1019_v43 = vrot.slane %v1017_v40, 1  ;;  %v1157_v44 = vsel %vm384_vm1, %v1154_v24, %v1156_v41 }
 0x28e   :  { %1984 = vmatmul.msk.bf16.gmra.mxu2 %vm1041_vm7, %v1157_v44 }
 0x28f   :  { %v1020_v45 = vsel %vm124_vm0, %v1015_v42, %v1019_v43  ;;  %v1023_v47 = vor.u32 %v1021_v46, %v1019_v43 }
 0x290   :  { %1946 = vmatmul.msk.bf16.gmra.mxu3 %vm1041_vm7, %v1020_v45 }
 0x29e   :  { %1985 = vmatmul.msk.bf16.gmra.mxu2 %vm1041_vm7, %v1156_v41 }
 0x2a0   :  { %1947 = vmatmul.msk.bf16.gmra.mxu3 %vm1041_vm7, %v1023_v47 }
 0x2d8   :  { %v1124_v57 = vpop.f32.mrf.mxu1 }
 0x2e0   :  { %v1126_v58 = vpop.f32.mrf.mxu1 }
 0x2e8   :  { %v1129_v63 = vpop.f32.mrf.mxu1 }
 0x2f0   :  { %v1131_v11 = vpop.f32.mrf.mxu1 }
 0x2f1   :  { %v1199_v59 = vpop.f32.mrf.mxu2 }
 0x2f3   :  { %v1067_v60 = vpop.f32.mrf.mxu3 }
 0x2f4   :  { %v1125_v61 = vadd.f32 %v1124_v57, %v1067_v60 }
 0x2f6   :  { %v1219_v0 = vadd.f32 %v1199_v59, %v1125_v61 }
 0x2f8   :  { %v1231_v4 = vadd.f32 %v2186_v1, %v1219_v0  ;;  %v1134_v18 = vpop.f32.mrf.mxu1 }
 0x2f9   :  { %v1201_v62 = vpop.f32.mrf.mxu2 }
 0x2fa   :  { %v1239_v8 = vmax.f32 %v1231_v4, 0.0 }
 0x2fb   :  { %v1069_v2 = vpop.f32.mrf.mxu3 }
 0x2fc   :  { %v1127_v3 = vadd.f32 %v1126_v58, %v1069_v2 }
 0x2fe   :  { %v1220_v5 = vadd.f32 %v1201_v62, %v1127_v3 }
 0x300   :  { %v1232_v6 = vadd.f32 %v2186_v1, %v1220_v5  ;;  %v1136_v28 = vpop.f32.mrf.mxu1 }
 0x301   :  { %v1204_v7 = vpop.f32.mrf.mxu2 }
 0x302   :  { %v1240_v9 = vmax.f32 %v1232_v6, 0.0 }
 0x303   :  { %v1072_v10 = vpop.f32.mrf.mxu3 }
 0x304   :  { %v1247_v12 = vpack.c.bf16 %v1240_v9, %v1239_v8  ;;  %v1130_v13 = vadd.f32 %v1129_v63, %v1072_v10 }
 0x306   :  { %2006 = vmatmul.msk.bf16.vlgmr.msra.gmra.mxu3 %vm1291_vm8, %v1247_v12  ;;  %2040 = vmatmul.msk.bf16.vlgmr.msra.gmra.mxu0 %vm1291_vm8, %v1247_v12  ;;  %v1221_v15 = vadd.f32 %v1204_v7, %v1130_v13 }
 0x308   :  { %v1233_v19 = vadd.f32 %v2186_v1, %v1221_v15  ;;  %v1139_v36 = vpop.f32.mrf.mxu1 }
 0x309   :  { %v1206_v14 = vpop.f32.mrf.mxu2 }
 0x30a   :  { %v1241_v23 = vmax.f32 %v1233_v19, 0.0  ;;  %v1415_v19 = vld [vmem:[%s2643_s8] sm:$0xf] }
 0x30b   :  { %v1074_v16 = vpop.f32.mrf.mxu3 }
 0x30c   :  { %v1132_v17 = vadd.f32 %v1131_v11, %v1074_v16 }
 0x30e   :  { %v1222_v20 = vadd.f32 %v1206_v14, %v1132_v17 }
 0x310   :  { %v1234_v21 = vadd.f32 %v2186_v1, %v1222_v20  ;;  %v1141_v45 = vpop.f32.mrf.mxu1  ;;  %v2045_v20 = vld [vmem:[%s2643_s8 + $0x4] sm:$0xf] }
 0x311   :  { %v1209_v22 = vpop.f32.mrf.mxu2 }
 0x312   :  { %v1242_v24 = vmax.f32 %v1234_v21, 0.0  ;;  %v2047_v21 = vld [vmem:[%s2643_s8 + $0x8] sm:$0xf] }
 0x313   :  { %v1077_v25 = vpop.f32.mrf.mxu3 }
 0x314   :  { %v1248_v26 = vpack.c.bf16 %v1242_v24, %v1241_v23  ;;  %v1135_v27 = vadd.f32 %v1134_v18, %v1077_v25  ;;  %v2172_v23 = vld [vmem:[%s2644_s9 + $0x8] sm:$0xff]  ;;  %v2171_v24 = vld [vmem:[%s2644_s9] sm:$0xff]  ;;  %v2174_v25 = vld [vmem:[%s2644_s9 + $0x18] sm:$0xff] }
 0x316   :  { %2007 = vmatmul.msk.bf16.gmra.mxu3 %vm1291_vm8, %v1248_v26  ;;  %2041 = vmatmul.msk.bf16.gmra.mxu0 %vm1291_vm8, %v1248_v26  ;;  %v1223_v30 = vadd.f32 %v1209_v22, %v1135_v27  ;;  %v2049_v22 = vld [vmem:[%s2643_s8 + $0xc] sm:$0xf]  ;;  %v2173_v26 = vld [vmem:[%s2644_s9 + $0x10] sm:$0xff]  ;;  %v2182_v27 = vld [vmem:[%s2645_s11 + $0x38] sm:$0xff] }
 0x318   :  { %v1235_v35 = vadd.f32 %v2186_v1, %v1223_v30 }
 0x319   :  { %v1211_v29 = vpop.f32.mrf.mxu2 }
 0x31a   :  { %v1243_v37 = vmax.f32 %v1235_v35, 0.0  ;;  %v2178_v35 = vld [vmem:[%s2645_s11 + $0x18] sm:$0xff] }
 0x31b   :  { %v1079_v31 = vpop.f32.mrf.mxu3 }
 0x31c   :  { %v1137_v32 = vadd.f32 %v1136_v28, %v1079_v31  ;;  %v2181_v28 = vld [vmem:[%s2645_s11 + $0x30] sm:$0xff]  ;;  %v2179_v31 = vld [vmem:[%s2645_s11 + $0x20] sm:$0xff] }
 0x31e   :  { %v1224_v33 = vadd.f32 %v1211_v29, %v1137_v32  ;;  %v2180_v29 = vld [vmem:[%s2645_s11 + $0x28] sm:$0xff] }
 0x320   :  { %v1236_v34 = vadd.f32 %v2186_v1, %v1224_v33 }
 0x321   :  { %v1214_v40 = vpop.f32.mrf.mxu2 }
 0x322   :  { %v1244_v38 = vmax.f32 %v1236_v34, 0.0 }
 0x323   :  { %v1082_v39 = vpop.f32.mrf.mxu3 }
 0x324   :  { %v1249_v41 = vpack.c.bf16 %v1244_v38, %v1243_v37  ;;  %v1140_v42 = vadd.f32 %v1139_v36, %v1082_v39  ;;  %v2177_v38 = vld [vmem:[%s2645_s11 + $0x10] sm:$0xff] }
 0x326   :  { %2008 = vmatmul.msk.bf16.gmra.mxu3 %vm1291_vm8, %v1249_v41  ;;  %2042 = vmatmul.msk.bf16.gmra.mxu0 %vm1291_vm8, %v1249_v41  ;;  %v1225_v43 = vadd.f32 %v1214_v40, %v1140_v42 }
 0x328   :  { %v1237_v48 = vadd.f32 %v2186_v1, %v1225_v43 }
 0x329   :  { %v1216_v47 = vpop.f32.mrf.mxu2 }
 0x32a   :  { %v1245_v51 = vmax.f32 %v1237_v48, 0.0 }
 0x32b   :  { %v1084_v44 = vpop.f32.mrf.mxu3 }
 0x32c   :  { %v1142_v46 = vadd.f32 %v1141_v45, %v1084_v44  ;;  %v2176_v45 = vld [vmem:[%s2645_s11 + $0x8] sm:$0xff] }
 0x32e   :  { %v1226_v49 = vadd.f32 %v1216_v47, %v1142_v46  ;;  %v2175_v46 = vld [vmem:[%s2645_s11] sm:$0xff] }
 0x330   :  { %v1238_v50 = vadd.f32 %v2186_v1, %v1226_v49  ;;  %v2187_v49 = vld [vmem:[%s2646_s10] ss:$0 sm:$0xff] }
 0x332   :  { %v1246_v52 = vmax.f32 %v1238_v50, 0.0 }
 0x334   :  { %v1250_v53 = vpack.c.bf16 %v1246_v52, %v1245_v51 }
 0x336   :  { %2009 = vmatmul.msk.bf16.gmra.mxu3 %vm1291_vm8, %v1250_v53  ;;  %2043 = vmatmul.msk.bf16.gmra.mxu0 %vm1291_vm8, %v1250_v53 }
 0x383   :  { %v1383_v54 = vpop.f32.mrf.mxu0 }
 0x389   :  { %v1313_v55 = vpop.f32.mrf.mxu3 }
 0x38a   :  { %v1403_v56 = vmax.f32 %v1313_v55, %v1383_v54 }
 0x38b   :  { %v1385_v57 = vpop.f32.mrf.mxu0 }
 0x391   :  { %v1315_v58 = vpop.f32.mrf.mxu3 }
 0x392   :  { %v1404_v16 = vmax.f32 %v1315_v58, %v1385_v57  ;;  %v2183_v57 = vld [vmem:[%s2649_s13] sm:$0xff] }
 0x393   :  { %v1388_v59 = vpop.f32.mrf.mxu0  ;;  %v2188_v58 = vld [vmem:[%s2647_s12] ss:$0 sm:$0xff] }
 0x394   :  { %v1411_v18 = vpack.c.bf16 %v1404_v16, %v1403_v56  ;;  %v2184_v56 = vld [vmem:[%s2649_s13 + $0x8] sm:$0xff] }
 0x399   :  { %v1318_v60 = vpop.f32.mrf.mxu3 }
 0x39a   :  { %v1405_v15 = vmax.f32 %v1318_v60, %v1388_v59 }
 0x39b   :  { %v1390_v61 = vpop.f32.mrf.mxu0 }
 0x3a1   :  { %v1320_v62 = vpop.f32.mrf.mxu3 }
 0x3a2   :  { %v1406_v13 = vmax.f32 %v1320_v62, %v1390_v61 }
 0x3a3   :  { %v1393_v63 = vpop.f32.mrf.mxu0 }
 0x3a4   :  { %v1412_v17 = vpack.c.bf16 %v1406_v13, %v1405_v15 }
 0x3a9   :  { %v1323_v0 = vpop.f32.mrf.mxu3 }
 0x3aa   :  { %v1407_v12 = vmax.f32 %v1323_v0, %v1393_v63  ;;  %v2189_v0 = vld [vmem:[%s2648_s14] ss:$0 sm:$0xff] }
 0x3ab   :  { %v1395_v2 = vpop.f32.mrf.mxu0 }
 0x3b1   :  { %v1325_v1 = vpop.f32.mrf.mxu3 }
 0x3b2   :  { %v1408_v10 = vmax.f32 %v1325_v1, %v1395_v2 }
 0x3b3   :  { %v1398_v3 = vpop.f32.mrf.mxu0 }
 0x3b4   :  { %v1413_v14 = vpack.c.bf16 %v1408_v10, %v1407_v12 }
 0x3b9   :  { %v1328_v4 = vpop.f32.mrf.mxu3 }
 0x3ba   :  { %v1409_v7 = vmax.f32 %v1328_v4, %v1398_v3 }
 0x3bb   :  { %v1400_v5 = vpop.f32.mrf.mxu0 }
 0x3c1   :  { %v1330_v6 = vpop.f32.mrf.mxu3 }
 0x3c2   :  { %v1410_v8 = vmax.f32 %v1330_v6, %v1400_v5 }
 0x3c4   :  { %v1414_v9 = vpack.c.bf16 %v1410_v8, %v1409_v7 }
 0x3c6   :  { %v1421_v11 = vsel %vm384_vm1, %v1414_v9, 0 }
 0x3c7   :  { %1427 = vmatpush.bf16.msrb.mxu1 %v1421_v11  ;;  %1445 = vmatpush.bf16.msrb.mxu2 %v1421_v11 }
 0x3c8   :  { %1469 = vmatpush.bf16.msrb.mxu3 %v1421_v11 }
 0x3cb   :  { %1428 = vmatpush.bf16.msrb.mxu1 %v1413_v14  ;;  %1446 = vmatpush.bf16.msrb.mxu2 %v1413_v14 }
 0x3cc   :  { %1470 = vmatpush.bf16.msrb.mxu3 %v1413_v14 }
 0x3cf   :  { %1429 = vmatpush.bf16.msrb.mxu1 %v1412_v17  ;;  %1447 = vmatpush.bf16.msrb.mxu2 %v1412_v17 }
 0x3d0   :  { %1471 = vmatpush.bf16.msrb.mxu3 %v1412_v17 }
 0x3d3   :  { %1430 = vmatpush.bf16.msrb.mxu1 %v1411_v18  ;;  %1448 = vmatpush.bf16.msrb.mxu2 %v1411_v18 }
 0x3d4   :  { %1472 = vmatpush.bf16.msrb.mxu3 %v1411_v18 }
 0x3d6   :  { %2044 = vmatmul.msk.bf16.vlgmr.msrb.gmra.mxu1 %vm1416_vm9, %v1415_v19  ;;  %2046 = vmatmul.msk.bf16.vlgmr.msrb.gmra.mxu2 %vm1416_vm9, %v2045_v20 }
 0x3d7   :  { %1487 = vmatpush.bf16.msra.mxu1 %v1421_v11  ;;  %2048 = vmatmul.msk.bf16.vlgmr.msrb.gmra.mxu3 %vm1416_vm9, %v2047_v21 }
 0x3d8   :  { %1553 = vmatpush.bf16.msra.mxu3 %v2172_v23  ;;  %1525 = vmatpush.bf16.msra.mxu2 %v2174_v25 }
 0x3db   :  { %1488 = vmatpush.bf16.msra.mxu1 %v1413_v14 }
 0x3dc   :  { %1554 = vmatpush.bf16.msra.mxu3 %v2171_v24  ;;  %1526 = vmatpush.bf16.msra.mxu2 %v2173_v26 }
 0x3df   :  { %1489 = vmatpush.bf16.msra.mxu1 %v1412_v17 }
 0x3e0   :  { %1679 = vmatpush.bf16.msrb.mxu2 %v2184_v56 }
 0x3e3   :  { %1490 = vmatpush.bf16.msra.mxu1 %v1411_v18 }
 0x3e4   :  { %1680 = vmatpush.bf16.msrb.mxu2 %v2183_v57 }
 0x3e6   :  { %2050 = vmatmul.msk.bf16.vlgmr.msra.gmra.mxu1 %vm1416_vm9, %v2049_v22 }
 0x3e7   :  { %1635 = vmatpush.bf16.msrb.mxu1 %v2182_v27 }
 0x3eb   :  { %1636 = vmatpush.bf16.msrb.mxu1 %v2181_v28 }
 0x3ef   :  { %1637 = vmatpush.bf16.msrb.mxu1 %v2180_v29 }
 0x3f3   :  { %1638 = vmatpush.bf16.msrb.mxu1 %v2179_v31 }
 0x3f7   :  { %1639 = vmatpush.bf16.msrb.mxu1 %v2178_v35 }
 0x3fb   :  { %1640 = vmatpush.bf16.msrb.mxu1 %v2177_v38 }
 0x3ff   :  { %1641 = vmatpush.bf16.msrb.mxu1 %v2176_v45 }
 0x403   :  { %1642 = vmatpush.bf16.msrb.mxu1 %v2175_v46 }
 0x453   :  { %v1432_v30 = vpop.f32.mrf.mxu1 }
 0x459   :  { %v1450_v32 = vpop.f32.mrf.mxu2 }
 0x45a   :  { %v1454_v33 = vmax.f32 %v1432_v30, %v1450_v32  ;;  %v1474_v34 = vpop.f32.mrf.mxu3 }
 0x45b   :  { %v1434_v36 = vpop.f32.mrf.mxu1 }
 0x45c   :  { %v1455_v37 = vpack.c.bf16 %v1454_v33, %v1454_v33 }
 0x45e   :  { %2072 = vmatmul.msk.bf16.vlgmr.msra.gmra.mxu3 %vm1515_vm10, %v1455_v37 }
 0x461   :  { %v1452_v39 = vpop.f32.mrf.mxu2 }
 0x462   :  { %v1476_v40 = vpop.f32.mrf.mxu3 }
 0x463   :  { %v1492_v41 = vpop.f32.mrf.mxu1 }
 0x464   :  { %v1496_v42 = vmax.f32 %v1474_v34, %v1492_v41 }
 0x466   :  { %v1497_v43 = vpack.c.bf16 %v1496_v42, %v1496_v42 }
 0x468   :  { %2063 = vmatmul.msk.bf16.vlgmr.msra.gmra.mxu2 %vm1515_vm10, %v1497_v43 }
 0x46b   :  { %v1494_v44 = vpop.f32.mrf.mxu1 }
 0x4e1   :  { %v1556_v47 = vpop.f32.mrf.mxu3 }
 0x4e9   :  { %v1558_v48 = vpop.f32.mrf.mxu3 }
 0x4eb   :  { %v1528_v50 = vpop.f32.mrf.mxu2 }
 0x4ec   :  { %v1557_v51 = vadd.f32 %v1556_v47, %v1528_v50 }
 0x4ee   :  { %v1564_v52 = vadd.f32 %v2187_v49, %v1557_v51 }
 0x4f0   :  { %v1565_v53 = vmax.f32 %v1564_v52, 0.0 }
 0x4f2   :  { %v1566_v54 = vpack.c.bf16 %v1565_v53, %v1565_v53 }
 0x4f3   :  { %v1530_v55 = vpop.f32.mrf.mxu2 }
 0x4f4   :  { %1643 = vmatmul.bf16.vlgmr.msrb.gmra.mxu1 %v1566_v54 }
 0x571   :  { %v1644_v59 = vpop.f32.mrf.mxu1 }
 0x572   :  { %v1645_v60 = vadd.f32 %v2188_v58, %v1644_v59 }
 0x574   :  { %v1648_v61 = vmax.f32 %v1645_v60, 0.0 }
 0x576   :  { %v1649_v62 = vpack.c.bf16 %v1648_v61, %v1648_v61 }
 0x578   :  { %2113 = vmatmul.msk.bf16.vlgmr.msrb.gmra.mxu2 %vm1515_vm10, %v1649_v62 }
 0x579   :  { %v1646_v63 = vpop.f32.mrf.mxu1 }
 0x5fb   :  { %v1682_v2 = vpop.f32.mrf.mxu2 }
 0x5fc   :  { %v1683_v1 = vadd.f32 %v2189_v0, %v1682_v2 }
 0x5fe   :  { %1686 = vst [vmem:[%s2650_s15] sm:$0xff] %v1683_v1 }
 0x603   :  { %v1684_v3 = vpop.f32.mrf.mxu2 }

</bundles_post_ra>
